<compile_context>
chip_gen: v6e
topology: v6e:2x2x1
jax: 0.10.0
libtpu: 0.0.40
codegen_flags: <defaults>
</compile_context>

<pallas_src>
import jax
import jax.numpy as jnp
from jax.experimental import pallas as pl
from jax.experimental.pallas import tpu as pltpu


# ----------------------------------------------------------------------------
# Kernel
# ----------------------------------------------------------------------------
def _quant_model_kernel(x1_ref, x2_ref,
                        w1_ref, b1_ref,
                        w2_ref, s2_ref, b2_ref,
                        w3a_ref, w3b_ref, b3_ref,
                        w4_ref, b4_ref,
                        o_ref,
                        acc_ref, h1_ref):
    k = pl.program_id(0)

    # Prologue: zero the fc2 accumulator and run the tiny fc1 branch once.
    @pl.when(k == 0)
    def _():
        acc_ref[...] = jnp.zeros_like(acc_ref)
        h1 = jnp.dot(x1_ref[...], w1_ref[...],
                     preferred_element_type=jnp.float32)
        h1_ref[...] = jnp.maximum(h1 + b1_ref[...], 0.0)

    # Hot loop: stream one K-tile of W2 (int8/bf16/f32 storage), upcast on the
    # VPU (hidden under the DMA) and accumulate the fc2 partial product in f32.
    w2_tile = w2_ref[...].astype(jnp.float32)
    acc_ref[...] += jnp.dot(x2_ref[...], w2_tile,
                            preferred_element_type=jnp.float32)

    # Epilogue: per-channel dequant scale, fc2 bias+ReLU, fc3 (concat trick), fc4.
    @pl.when(k == pl.num_programs(0) - 1)
    def _():
        h2 = jnp.maximum(acc_ref[...] * s2_ref[...] + b2_ref[...], 0.0)
        h1 = h1_ref[...]
        h3 = jnp.maximum(
            jnp.dot(h1, w3a_ref[...], preferred_element_type=jnp.float32)
            + jnp.dot(h2, w3b_ref[...], preferred_element_type=jnp.float32)
            + b3_ref[...], 0.0)
        out = (jnp.dot(h3, w4_ref[...], preferred_element_type=jnp.float32)
               + b4_ref[...])
        o_ref[...] = out.astype(o_ref.dtype)


# ----------------------------------------------------------------------------
# One-time parameter preparation (do NOT call per forward)
# ----------------------------------------------------------------------------
def _pick_tk(f2, tk_max):
    """Largest multiple of 128 <= tk_max that divides f2 (no padding needed).
    Falls back to padding f2 up to a multiple of the rounded tk_max."""
    cap = max(128, min(int(tk_max), int(f2)))
    cap = (cap // 128) * 128
    for t in range(cap, 127, -128):
        if f2 % t == 0:
            return t, f2
    tk = cap
    f2_pad = ((f2 + tk - 1) // tk) * tk
    return tk, f2_pad


def _quantize_w2_int8(w2):
    """Per-output-channel symmetric int8 quantization: w2 ~= q * scale."""
    absmax = jnp.max(jnp.abs(w2), axis=0)
    scale = jnp.where(absmax > 0, absmax / 127.0, 1.0).astype(jnp.float32)
    q = jnp.clip(jnp.round(w2 / scale), -127, 127).astype(jnp.int8)
    return q, scale.reshape(1, -1)


def prepare_params(params, *, w2_format="int8", tk_max=12800):
    """Convert/layout the weights ONCE for the Pallas kernel.

    w2_format: "int8" (recommended, per-channel scales), "bf16", or "f32".
    tk_max:    upper bound for the fc2 K-tile.  v7x: ~12800 (64 MiB VMEM);
               v6e/v5e: 19200-25600 together with vmem_limit_bytes ~96 MiB.
    """
    w1, b1, w2, b2, w3, b3, w4, b4 = (
        params[k] for k in ("w1", "b1", "w2", "b2", "w3", "b3", "w4", "b4"))
    f1, hidden = w1.shape
    f2 = w2.shape[0]
    out_q = w4.shape[1]

    tk, f2_pad = _pick_tk(f2, tk_max)

    if w2_format == "int8":
        w2_store, w2_scale = _quantize_w2_int8(w2.astype(jnp.float32))
    elif w2_format == "bf16":
        w2_store = w2.astype(jnp.bfloat16)
        w2_scale = jnp.ones((1, hidden), jnp.float32)
    else:
        w2_store = w2.astype(jnp.float32)
        w2_scale = jnp.ones((1, hidden), jnp.float32)

    if f2_pad != f2:   # one-time zero pad (contributes nothing to the dot)
        w2_store = jnp.pad(w2_store, ((0, f2_pad - f2), (0, 0)))

    prepared = dict(
        w1=w1.astype(jnp.float32),
        b1=b1.reshape(1, -1).astype(jnp.float32),
        w2=w2_store,
        w2_scale=w2_scale,
        b2=b2.reshape(1, -1).astype(jnp.float32),
        w3a=w3[:hidden, :].astype(jnp.float32),   # concat([h1, h2]) @ W3 split
        w3b=w3[hidden:, :].astype(jnp.float32),
        b3=b3.reshape(1, -1).astype(jnp.float32),
        w4=w4.astype(jnp.float32),
        b4=b4.reshape(1, -1).astype(jnp.float32),
        meta=dict(f1=f1, f2=f2, f2_pad=f2_pad, tk=tk, hidden=hidden,
                  out_q=out_q, w2_format=w2_format),
    )
    return jax.tree_util.tree_map(
        lambda a: a if not isinstance(a, jnp.ndarray) else jax.block_until_ready(a),
        prepared)


def dequantized_params(params, prepared):
    """Plain-JAX params with w2 replaced by its dequantized value (for tests)."""
    meta = prepared["meta"]
    w2_deq = (prepared["w2"][:meta["f2"], :].astype(jnp.float32)
              * prepared["w2_scale"])
    out = dict(params)
    out["w2"] = w2_deq
    return out


# ----------------------------------------------------------------------------
# Forward wrapper
# ----------------------------------------------------------------------------
def quant_model_forward(x1, x2, prepared, *,
                        vmem_limit_bytes=48 * 1024 * 1024,
                        w2_buffers=2):
    """x1: (B, F1) tabular; x2: (B, C, H, W) NCHW CT-scan (flattened inside).

    `prepared` must come from prepare_params (weights already converted)."""
    meta = prepared["meta"]
    f1, f2, f2_pad, tk = meta["f1"], meta["f2"], meta["f2_pad"], meta["tk"]
    hidden, out_q = meta["hidden"], meta["out_q"]
    B = x1.shape[0]

    # Activations stay f32 (x2 is ~KBs-MBs vs. W2's tens of MB -> keep accuracy).
    x1c = x1.astype(jnp.float32)
    x2_flat = x2.reshape(-1, f2).astype(jnp.float32)   # == x2.view(-1, F2)
    if f2_pad != f2:
        x2_flat = jnp.pad(x2_flat, ((0, 0), (0, f2_pad - f2)))
    num_k = f2_pad // tk

    w2_spec_kwargs = {}
    if w2_buffers is not None and w2_buffers > 2:
        w2_spec_kwargs = dict(pipeline_mode=pl.Buffered(int(w2_buffers)))

    in_specs = [
        pl.BlockSpec((B, f1), lambda k: (0, 0)),              # x1 (resident)
        pl.BlockSpec((B, tk), lambda k: (0, k)),               # x2 K-tile
        pl.BlockSpec((f1, hidden), lambda k: (0, 0)),          # W1 (resident)
        pl.BlockSpec((1, hidden), lambda k: (0, 0)),           # b1
        pl.BlockSpec((tk, hidden), lambda k: (k, 0),           # W2 K-tile (hot)
                     **w2_spec_kwargs),
        pl.BlockSpec((1, hidden), lambda k: (0, 0)),           # W2 per-chan scale
        pl.BlockSpec((1, hidden), lambda k: (0, 0)),           # b2
        pl.BlockSpec((hidden, hidden), lambda k: (0, 0)),      # W3[:H] (resident)
        pl.BlockSpec((hidden, hidden), lambda k: (0, 0)),      # W3[H:] (resident)
        pl.BlockSpec((1, hidden), lambda k: (0, 0)),           # b3
        pl.BlockSpec((hidden, out_q), lambda k: (0, 0)),       # W4 (resident)
        pl.BlockSpec((1, out_q), lambda k: (0, 0)),            # b4
    ]
    out_specs = pl.BlockSpec((B, out_q), lambda k: (0, 0))

    grid_spec = pltpu.PrefetchScalarGridSpec(
        num_scalar_prefetch=0,
        grid=(num_k,),
        in_specs=in_specs,
        out_specs=out_specs,
        scratch_shapes=[
            pltpu.VMEM((B, hidden), jnp.float32),   # fc2 accumulator
            pltpu.VMEM((B, hidden), jnp.float32),   # fc1 branch result
        ],
    )

    return pl.pallas_call(
        _quant_model_kernel,
        out_shape=jax.ShapeDtypeStruct((B, out_q), jnp.float32),
        grid_spec=grid_spec,
        compiler_params=pltpu.CompilerParams(
            dimension_semantics=("arbitrary",),      # K reduction, resident output
            vmem_limit_bytes=vmem_limit_bytes),
    )(x1c, x2_flat,
      prepared["w1"], prepared["b1"],
      prepared["w2"], prepared["w2_scale"], prepared["b2"],
      prepared["w3a"], prepared["w3b"], prepared["b3"],
      prepared["w4"], prepared["b4"])


# ----------------------------------------------------------------------------
# Init + plain-JAX reference (mirrors the PyTorch forward)
# ----------------------------------------------------------------------------
def init_params(key, in_tabular_features, in_ctscan_features, hidden, out_quantiles):
    """torch.nn.Linear-style init (uniform +-1/sqrt(fan_in)); W stored (in, out)."""
    def linear(k, fan_in, fan_out):
        kw, kb = jax.random.split(k)
        bound = 1.0 / jnp.sqrt(jnp.float32(fan_in))
        w = jax.random.uniform(kw, (fan_in, fan_out), jnp.float32, -bound, bound)
        b = jax.random.uniform(kb, (fan_out,), jnp.float32, -bound, bound)
        return w, b

    k1, k2, k3, k4 = jax.random.split(key, 4)
    w1, b1 = linear(k1, in_tabular_features, hidden)
    w2, b2 = linear(k2, in_ctscan_features, hidden)
    w3, b3 = linear(k3, 2 * hidden, hidden)
    w4, b4 = linear(k4, hidden, out_quantiles)
    return dict(w1=w1, b1=b1, w2=w2, b2=b2, w3=w3, b3=b3, w4=w4, b4=b4)


def reference_forward(x1, x2, params):
    f2 = params["w2"].shape[0]
    h1 = jax.nn.relu(jnp.dot(x1, params["w1"],
                             preferred_element_type=jnp.float32) + params["b1"])
    h2 = jax.nn.relu(jnp.dot(x2.reshape(-1, f2), params["w2"],
                             preferred_element_type=jnp.float32) + params["b2"])
    h = jnp.concatenate([h1, h2], axis=1)
    h3 = jax.nn.relu(jnp.dot(h, params["w3"],
                             preferred_element_type=jnp.float32) + params["b3"])
    return (jnp.dot(h3, params["w4"],
                    preferred_element_type=jnp.float32) + params["b4"])


# ----------------------------------------------------------------------------
# Demo / self-test (small shapes consistent with the module)
# ----------------------------------------------------------------------------
if __name__ == "__main__":
    # Tabular features = 9 (module default), CT-scan branch = C*H*W = 3*16*16
    # = 768 (scaled down from 76800 for a fast synthetic run), hidden = 512,
    # out_quantiles = 3.  tk_max=256 -> tk=256 (divides 768) -> 3 K-steps so
    # prologue / accumulate / epilogue paths are all exercised.
    B = 2
    IN_TAB = 9
    C, H, W = 3, 16, 16
    IN_CT = C * H * W
    HIDDEN = 512
    OUT_Q = 3

    key = jax.random.PRNGKey(0)
    kp, kx1, kx2 = jax.random.split(key, 3)

    params = init_params(kp, IN_TAB, IN_CT, HIDDEN, OUT_Q)
    x1 = jax.random.normal(kx1, (B, IN_TAB), jnp.float32)
    x2 = jax.random.normal(kx2, (B, C, H, W), jnp.float32)   # NCHW like PyTorch

    # One-time weight preparation (int8 W2 + per-channel scales, W3 split, ...).
    prepared = prepare_params(params, w2_format="int8", tk_max=256)

    out = quant_model_forward(x1, x2, prepared)
    out = jax.block_until_ready(out)

    # Matched reference: same int8-dequantized W2, full f32 math everywhere.
    ref_matched = reference_forward(x1, x2, dequantized_params(params, prepared))
    # Loose check vs. the exact f32 PyTorch-equivalent forward (quant error only).
    ref_f32 = reference_forward(x1, x2, params)

    assert out.shape == (B, OUT_Q)
    assert jnp.allclose(out, ref_matched, atol=5e-3, rtol=2e-2), \
        "Pallas output mismatch vs dequantized-W2 f32 reference"
    assert jnp.allclose(out, ref_f32, atol=5e-2, rtol=5e-2), \
        "Pallas output mismatch vs full-f32 reference"

    print("KERNEL_OK")
</pallas_src>

<mosaic_0001>
module attributes {stable_mosaic.version = 11 : i64} {
  func.func @_quant_model_kernel(%arg0: i32, %arg1: memref<2x9xf32, #tpu.memory_space<vmem>>, %arg2: memref<2x256xf32, #tpu.memory_space<vmem>>, %arg3: memref<9x512xf32, #tpu.memory_space<vmem>>, %arg4: memref<1x512xf32, #tpu.memory_space<vmem>>, %arg5: memref<256x512xi8, #tpu.memory_space<vmem>>, %arg6: memref<1x512xf32, #tpu.memory_space<vmem>>, %arg7: memref<1x512xf32, #tpu.memory_space<vmem>>, %arg8: memref<512x512xf32, #tpu.memory_space<vmem>>, %arg9: memref<512x512xf32, #tpu.memory_space<vmem>>, %arg10: memref<1x512xf32, #tpu.memory_space<vmem>>, %arg11: memref<512x3xf32, #tpu.memory_space<vmem>>, %arg12: memref<1x3xf32, #tpu.memory_space<vmem>>, %arg13: memref<2x3xf32, #tpu.memory_space<vmem>>, %arg14: memref<2x512xf32, #tpu.memory_space<vmem>>, %arg15: memref<2x512xf32, #tpu.memory_space<vmem>>) attributes {dimension_semantics = [#tpu.dimension_semantics<arbitrary>], iteration_bounds = array<i64: 3>, scalar_prefetch = 0 : i64, scratch_operands = 2 : i64, tpu.core_type = #tpu.core_type<tc>, window_params = [{pipeline_mode = #tpu.pipeline_mode<synchronous>, transform_indices = @transform_0, window_bounds = array<i64: 2, 9>}, {transform_indices = @transform_1, window_bounds = array<i64: 2, 256>}, {pipeline_mode = #tpu.pipeline_mode<synchronous>, transform_indices = @transform_2, window_bounds = array<i64: 9, 512>}, {pipeline_mode = #tpu.pipeline_mode<synchronous>, transform_indices = @transform_3, window_bounds = array<i64: 1, 512>}, {transform_indices = @transform_4, window_bounds = array<i64: 256, 512>}, {pipeline_mode = #tpu.pipeline_mode<synchronous>, transform_indices = @transform_5, window_bounds = array<i64: 1, 512>}, {pipeline_mode = #tpu.pipeline_mode<synchronous>, transform_indices = @transform_6, window_bounds = array<i64: 1, 512>}, {pipeline_mode = #tpu.pipeline_mode<synchronous>, transform_indices = @transform_7, window_bounds = array<i64: 512, 512>}, {pipeline_mode = #tpu.pipeline_mode<synchronous>, transform_indices = @transform_8, window_bounds = array<i64: 512, 512>}, {pipeline_mode = #tpu.pipeline_mode<synchronous>, transform_indices = @transform_9, window_bounds = array<i64: 1, 512>}, {pipeline_mode = #tpu.pipeline_mode<synchronous>, transform_indices = @transform_10, window_bounds = array<i64: 512, 3>}, {pipeline_mode = #tpu.pipeline_mode<synchronous>, transform_indices = @transform_11, window_bounds = array<i64: 1, 3>}, {pipeline_mode = #tpu.pipeline_mode<synchronous>, transform_indices = @transform_12, window_bounds = array<i64: 2, 3>}]} {
    %c0_i32 = arith.constant 0 : i32
    %0 = arith.cmpi eq, %arg0, %c0_i32 : i32
    %1 = arith.extui %0 : i1 to i32
    %c0_i32_0 = arith.constant 0 : i32
    %2 = arith.cmpi ne, %1, %c0_i32_0 : i32
    scf.if %2 {
      %cst_9 = arith.constant 0.000000e+00 : f32
      %13 = vector.broadcast %cst_9 : f32 to vector<2x512xf32>
      %c0_10 = arith.constant 0 : index
      %c0_11 = arith.constant 0 : index
      %14 = vector.load %arg14[%c0_10, %c0_11] : memref<2x512xf32, #tpu.memory_space<vmem>>, vector<2x512xf32>
      tpu.vector_store %arg14[%c0_10, %c0_11], %13 {strides = array<i32>} : memref<2x512xf32, #tpu.memory_space<vmem>>, vector<2x512xf32>,
      %c0_12 = arith.constant 0 : index
      %c0_13 = arith.constant 0 : index
      %15 = vector.load %arg1[%c0_12, %c0_13] : memref<2x9xf32, #tpu.memory_space<vmem>>, vector<2x9xf32>
      %c0_14 = arith.constant 0 : index
      %c0_15 = arith.constant 0 : index
      %16 = vector.load %arg3[%c0_14, %c0_15] : memref<9x512xf32, #tpu.memory_space<vmem>>, vector<9x512xf32>
      %cst_16 = arith.constant dense<0.000000e+00> : vector<2x512xf32>
      %17 = tpu.matmul %15, %16, %cst_16 {dimension_numbers = #tpu.dot_dimension_numbers<[1], [0], [0], [1], [0, 0, 1, 1], [], []>} : vector<2x9xf32>, vector<9x512xf32>, vector<2x512xf32> -> vector<2x512xf32>
      %c0_17 = arith.constant 0 : index
      %c0_18 = arith.constant 0 : index
      %18 = vector.load %arg4[%c0_17, %c0_18] : memref<1x512xf32, #tpu.memory_space<vmem>>, vector<1x512xf32>
      %19 = vector.broadcast %18 : vector<1x512xf32> to vector<2x512xf32>
      %20 = arith.addf %17, %19 : vector<2x512xf32>
      %cst_19 = arith.constant 0.000000e+00 : f32
      %21 = vector.broadcast %cst_19 : f32 to vector<2x512xf32>
      %22 = arith.maximumf %20, %21 : vector<2x512xf32>
      %c0_20 = arith.constant 0 : index
      %c0_21 = arith.constant 0 : index
      %23 = vector.load %arg15[%c0_20, %c0_21] : memref<2x512xf32, #tpu.memory_space<vmem>>, vector<2x512xf32>
      tpu.vector_store %arg15[%c0_20, %c0_21], %22 {strides = array<i32>} : memref<2x512xf32, #tpu.memory_space<vmem>>, vector<2x512xf32>,
    } else {
    }
    %c0 = arith.constant 0 : index
    %c0_1 = arith.constant 0 : index
    %3 = vector.load %arg5[%c0, %c0_1] : memref<256x512xi8, #tpu.memory_space<vmem>>, vector<256x512xi8>
    %4 = arith.sitofp %3 : vector<256x512xi8> to vector<256x512xf32>
    %c0_2 = arith.constant 0 : index
    %c0_3 = arith.constant 0 : index
    %5 = vector.load %arg14[%c0_2, %c0_3] : memref<2x512xf32, #tpu.memory_space<vmem>>, vector<2x512xf32>
    %c0_4 = arith.constant 0 : index
    %c0_5 = arith.constant 0 : index
    %6 = vector.load %arg2[%c0_4, %c0_5] : memref<2x256xf32, #tpu.memory_space<vmem>>, vector<2x256xf32>
    %cst = arith.constant dense<0.000000e+00> : vector<2x512xf32>
    %7 = tpu.matmul %6, %4, %cst {dimension_numbers = #tpu.dot_dimension_numbers<[1], [0], [0], [1], [0, 0, 1, 1], [], []>} : vector<2x256xf32>, vector<256x512xf32>, vector<2x512xf32> -> vector<2x512xf32>
    %8 = arith.addf %5, %7 : vector<2x512xf32>
    %c0_6 = arith.constant 0 : index
    %c0_7 = arith.constant 0 : index
    %9 = vector.load %arg14[%c0_6, %c0_7] : memref<2x512xf32, #tpu.memory_space<vmem>>, vector<2x512xf32>
    tpu.vector_store %arg14[%c0_6, %c0_7], %8 {strides = array<i32>} : memref<2x512xf32, #tpu.memory_space<vmem>>, vector<2x512xf32>,
    %c2_i32 = arith.constant 2 : i32
    %10 = arith.cmpi eq, %arg0, %c2_i32 : i32
    %11 = arith.extui %10 : i1 to i32
    %c0_i32_8 = arith.constant 0 : i32
    %12 = arith.cmpi ne, %11, %c0_i32_8 : i32
    scf.if %12 {
      %c0_9 = arith.constant 0 : index
      %c0_10 = arith.constant 0 : index
      %13 = vector.load %arg14[%c0_9, %c0_10] : memref<2x512xf32, #tpu.memory_space<vmem>>, vector<2x512xf32>
      %c0_11 = arith.constant 0 : index
      %c0_12 = arith.constant 0 : index
      %14 = vector.load %arg6[%c0_11, %c0_12] : memref<1x512xf32, #tpu.memory_space<vmem>>, vector<1x512xf32>
      %15 = vector.broadcast %14 : vector<1x512xf32> to vector<2x512xf32>
      %16 = arith.mulf %13, %15 : vector<2x512xf32>
      %c0_13 = arith.constant 0 : index
      %c0_14 = arith.constant 0 : index
      %17 = vector.load %arg7[%c0_13, %c0_14] : memref<1x512xf32, #tpu.memory_space<vmem>>, vector<1x512xf32>
      %18 = vector.broadcast %17 : vector<1x512xf32> to vector<2x512xf32>
      %19 = arith.addf %16, %18 : vector<2x512xf32>
      %cst_15 = arith.constant 0.000000e+00 : f32
      %20 = vector.broadcast %cst_15 : f32 to vector<2x512xf32>
      %21 = arith.maximumf %19, %20 : vector<2x512xf32>
      %c0_16 = arith.constant 0 : index
      %c0_17 = arith.constant 0 : index
      %22 = vector.load %arg15[%c0_16, %c0_17] : memref<2x512xf32, #tpu.memory_space<vmem>>, vector<2x512xf32>
      %c0_18 = arith.constant 0 : index
      %c0_19 = arith.constant 0 : index
      %23 = vector.load %arg8[%c0_18, %c0_19] : memref<512x512xf32, #tpu.memory_space<vmem>>, vector<512x512xf32>
      %cst_20 = arith.constant dense<0.000000e+00> : vector<2x512xf32>
      %24 = tpu.matmul %22, %23, %cst_20 {dimension_numbers = #tpu.dot_dimension_numbers<[1], [0], [0], [1], [0, 0, 1, 1], [], []>} : vector<2x512xf32>, vector<512x512xf32>, vector<2x512xf32> -> vector<2x512xf32>
      %c0_21 = arith.constant 0 : index
      %c0_22 = arith.constant 0 : index
      %25 = vector.load %arg9[%c0_21, %c0_22] : memref<512x512xf32, #tpu.memory_space<vmem>>, vector<512x512xf32>
      %cst_23 = arith.constant dense<0.000000e+00> : vector<2x512xf32>
      %26 = tpu.matmul %21, %25, %cst_23 {dimension_numbers = #tpu.dot_dimension_numbers<[1], [0], [0], [1], [0, 0, 1, 1], [], []>} : vector<2x512xf32>, vector<512x512xf32>, vector<2x512xf32> -> vector<2x512xf32>
      %27 = arith.addf %24, %26 : vector<2x512xf32>
      %c0_24 = arith.constant 0 : index
      %c0_25 = arith.constant 0 : index
      %28 = vector.load %arg10[%c0_24, %c0_25] : memref<1x512xf32, #tpu.memory_space<vmem>>, vector<1x512xf32>
      %29 = vector.broadcast %28 : vector<1x512xf32> to vector<2x512xf32>
      %30 = arith.addf %27, %29 : vector<2x512xf32>
      %cst_26 = arith.constant 0.000000e+00 : f32
      %31 = vector.broadcast %cst_26 : f32 to vector<2x512xf32>
      %32 = arith.maximumf %30, %31 : vector<2x512xf32>
      %c0_27 = arith.constant 0 : index
      %c0_28 = arith.constant 0 : index
      %33 = vector.load %arg11[%c0_27, %c0_28] : memref<512x3xf32, #tpu.memory_space<vmem>>, vector<512x3xf32>
      %cst_29 = arith.constant dense<0.000000e+00> : vector<2x3xf32>
      %34 = tpu.matmul %32, %33, %cst_29 {dimension_numbers = #tpu.dot_dimension_numbers<[1], [0], [0], [1], [0, 0, 1, 1], [], []>} : vector<2x512xf32>, vector<512x3xf32>, vector<2x3xf32> -> vector<2x3xf32>
      %c0_30 = arith.constant 0 : index
      %c0_31 = arith.constant 0 : index
      %35 = vector.load %arg12[%c0_30, %c0_31] : memref<1x3xf32, #tpu.memory_space<vmem>>, vector<1x3xf32>
      %36 = vector.broadcast %35 : vector<1x3xf32> to vector<2x3xf32>
      %37 = arith.addf %34, %36 : vector<2x3xf32>
      %c0_32 = arith.constant 0 : index
      %c0_33 = arith.constant 0 : index
      %38 = vector.load %arg13[%c0_32, %c0_33] : memref<2x3xf32, #tpu.memory_space<vmem>>, vector<2x3xf32>
      tpu.vector_store %arg13[%c0_32, %c0_33], %37 {strides = array<i32>} : memref<2x3xf32, #tpu.memory_space<vmem>>, vector<2x3xf32>,
    } else {
    }
    return
  }
  func.func @transform_0(%arg0: i32) -> (i32, i32) {
    %c0_i32 = arith.constant 0 : i32
    %c0_i32_0 = arith.constant 0 : i32
    %c0_i32_1 = arith.constant 0 : i32
    return %c0_i32, %c0_i32_0 : i32, i32
  }
  func.func @transform_1(%arg0: i32) -> (i32, i32) {
    %c0_i32 = arith.constant 0 : i32
    %c0_i32_0 = arith.constant 0 : i32
    return %c0_i32, %arg0 : i32, i32
  }
  func.func @transform_2(%arg0: i32) -> (i32, i32) {
    %c0_i32 = arith.constant 0 : i32
    %c0_i32_0 = arith.constant 0 : i32
    %c0_i32_1 = arith.constant 0 : i32
    return %c0_i32, %c0_i32_0 : i32, i32
  }
  func.func @transform_3(%arg0: i32) -> (i32, i32) {
    %c0_i32 = arith.constant 0 : i32
    %c0_i32_0 = arith.constant 0 : i32
    %c0_i32_1 = arith.constant 0 : i32
    return %c0_i32, %c0_i32_0 : i32, i32
  }
  func.func @transform_4(%arg0: i32) -> (i32, i32) {
    %c0_i32 = arith.constant 0 : i32
    %c0_i32_0 = arith.constant 0 : i32
    return %arg0, %c0_i32 : i32, i32
  }
  func.func @transform_5(%arg0: i32) -> (i32, i32) {
    %c0_i32 = arith.constant 0 : i32
    %c0_i32_0 = arith.constant 0 : i32
    %c0_i32_1 = arith.constant 0 : i32
    return %c0_i32, %c0_i32_0 : i32, i32
  }
  func.func @transform_6(%arg0: i32) -> (i32, i32) {
    %c0_i32 = arith.constant 0 : i32
    %c0_i32_0 = arith.constant 0 : i32
    %c0_i32_1 = arith.constant 0 : i32
    return %c0_i32, %c0_i32_0 : i32, i32
  }
  func.func @transform_7(%arg0: i32) -> (i32, i32) {
    %c0_i32 = arith.constant 0 : i32
    %c0_i32_0 = arith.constant 0 : i32
    %c0_i32_1 = arith.constant 0 : i32
    return %c0_i32, %c0_i32_0 : i32, i32
  }
  func.func @transform_8(%arg0: i32) -> (i32, i32) {
    %c0_i32 = arith.constant 0 : i32
    %c0_i32_0 = arith.constant 0 : i32
    %c0_i32_1 = arith.constant 0 : i32
    return %c0_i32, %c0_i32_0 : i32, i32
  }
  func.func @transform_9(%arg0: i32) -> (i32, i32) {
    %c0_i32 = arith.constant 0 : i32
    %c0_i32_0 = arith.constant 0 : i32
    %c0_i32_1 = arith.constant 0 : i32
    return %c0_i32, %c0_i32_0 : i32, i32
  }
  func.func @transform_10(%arg0: i32) -> (i32, i32) {
    %c0_i32 = arith.constant 0 : i32
    %c0_i32_0 = arith.constant 0 : i32
    %c0_i32_1 = arith.constant 0 : i32
    return %c0_i32, %c0_i32_0 : i32, i32
  }
  func.func @transform_11(%arg0: i32) -> (i32, i32) {
    %c0_i32 = arith.constant 0 : i32
    %c0_i32_0 = arith.constant 0 : i32
    %c0_i32_1 = arith.constant 0 : i32
    return %c0_i32, %c0_i32_0 : i32, i32
  }
  func.func @transform_12(%arg0: i32) -> (i32, i32) {
    %c0_i32 = arith.constant 0 : i32
    %c0_i32_0 = arith.constant 0 : i32
    %c0_i32_1 = arith.constant 0 : i32
    return %c0_i32, %c0_i32_0 : i32, i32
  }
}

</mosaic_0001>

<bundles_post_ra>
// kernel: tpu_custom_call.1
= control target key start
LH: loop header
LB: loop body
LE: loop exit
PB: predicated region body
PF: predicated region fallthrough
CT: control target
= control target key end

     0   :  { %s3739_s0 = inlined_call_operand.vmem [shape: f32[2,9], index: 0, kind: input, shape index: {}]   ;;  %s3740_s1 = inlined_call_operand.vmem [shape: f32[2,768], index: 1, kind: input, shape index: {}]   ;;  %s3741_s2 = inlined_call_operand.vmem [shape: f32[9,512], index: 2, kind: input, shape index: {}]   ;;  %s3742_s3 = inlined_call_operand.vmem [shape: f32[1,512], index: 3, kind: input, shape index: {}]   ;;  %s3743_s4 = inlined_call_operand.hbm [shape: s8[768,512], index: 4, kind: input, shape index: {}]   ;;  %s3744_s5 = inlined_call_operand.vmem [shape: f32[1,512], index: 5, kind: input, shape index: {}]   ;;  %s3745_s6 = inlined_call_operand.vmem [shape: f32[1,512], index: 6, kind: input, shape index: {}]   ;;  %s3746_s7 = inlined_call_operand.hbm [shape: f32[512,512], index: 7, kind: input, shape index: {}]   ;;  %s3747_s8 = inlined_call_operand.hbm [shape: f32[512,512], index: 8, kind: input, shape index: {}]   ;;  %s3748_s9 = inlined_call_operand.vmem [shape: f32[1,512], index: 9, kind: input, shape index: {}]   ;;  %s3749_s10 = inlined_call_operand.vmem [shape: f32[512,3], index: 10, kind: input, shape index: {}]   ;;  %s3750_s11 = inlined_call_operand.vmem [shape: f32[1,3], index: 11, kind: input, shape index: {}]   ;;  %s3751_s12 = inlined_call_operand.hbm [shape: f32[2,3], index: 12, kind: output, shape index: {}]  }
   0x1   :  { %3757 = sst [smem:[#allocation14_spill]] %s3746_s7 }
   0x2   :  { %3758 = sst [smem:[#allocation15_spill]] %s3747_s8 }
   0x3   :  { %17 = vsyncpa [#allocation5], 0 }
   0x4   :  { %19 = vsyncpa [#allocation5 + $0x1], 0 }
   0x5   :  { %20 = vsyncpa [#allocation8], 0 }
   0x6   :  { %21 = vsyncpa [#allocation6], 0  ;;  %s3222_s21 = smov 0   ;;  %s3224_s22 = smov 0  }
   0x7   :  { %s3226_s23 = smov 0   ;;  %s3228_s24 = smov 0  }
   0x8 LB: > { %s3241_s25 = sadd.s32 4294967295, %s3146_s24   ;;  %p136_p0 = scmp.ne.s32.totalorder %s3138_s22, %s3134_s21  ;;  %s3146_s24 = sphi %s3228_s24, %s3775_s24   ;;  %s3142_s23 = sphi %s3226_s23, %s3774_s23   ;;  %s3138_s22 = sphi %s3224_s22, %s3773_s22   ;;  %s3134_s21 = sphi %s3222_s21, %s3772_s21  }
   0x9   : > { %p3754_p1 = scmp.eq.s32.totalorder %s3241_s25, 0  ;;  %p2699_p2 = scmp.ge.s32.totalorder %s3146_s24, 1 }
   0xa   : > { %p315_p3 = scmp.lt.s32.totalorder %s3146_s24, 4  ;;  %s3148_s28 = smov [#allocation7]  }
   0xb   : > { %p3250_p5 = por %p3754_p1, %p136_p0  ;;  %s342_s29 = sshll.u32 %s3148_s28, 4  ;;  %s343_s29 = int_to_ptr.vmem [resolvable:$true] %s342_s29 }
   0xc   : > { %p3254_p6 = pnand %p2699_p2, %p315_p3  ;;  %s3149_s13 = smov [#allocation9]  }
   0xd   : > { %s3759_s26 = scalar_select %p3250_p5, 1, 0 }
   0xe   : > { %s3760_s27 = scalar_select %p3254_p6, 1, 0 }
   0xf   : > { %p2941_p7 = pneg %p3254_p6  ;;  %s355_s14 = sshll.u32 %s3149_s13, 4  ;;  %s356_s14 = int_to_ptr.vmem [resolvable:$true] %s355_s14 }
  0x10   : > { %s3011_s15 = scalar_lea.vmem %s343_s29, 32768  ;;  %p3019_p13 = scmp.lt.s32.totalorder %s343_s29, %s343_s29 }
  0x11   : > { %p3262_p8 = pnand %p2941_p7, %p3754_p1  ;;  %p3012_p10 = scmp.ne.s32.totalorder %s343_s29, %s3011_s15 }
  0x12   : > { %p3020_p0 = scmp.lt.s32.totalorder %s3011_s15, %s3011_s15 }
  0x13   : > { %p3002_p9 = pneg %p3262_p8 }
  0x14   : > { %p3021_p2 = por %p3020_p0, %p3019_p13 }
  0x15   : > { %p3014_p11 = pnand %p3012_p10, %p3002_p9 }
  0x17   : > { %p3015_p12 = pneg %p3014_p11 }
  0x19   : > { %p3022_p3 = pnand %p3021_p2, %p3015_p12 }
  0x1b   : > { %3025 = shalt.err (!%p3022_p3)
}
  0x1c   : > { %s3752_s16 = smov 512   ;;  %s3753_s17 = smov 32  }
  0x1d   : > { %s3762_s7 = sld [smem:[#allocation14_spill]]  ;;  %s3037_s20 = scalar_lea.vmem %s356_s14, 32768 }
  0x1e   : > { %p3038_p7 = scmp.ne.s32.totalorder %s356_s14, %s3037_s20  ;;  %p3045_p12 = scmp.lt.s32.totalorder %s356_s14, %s356_s14 }
  0x1f   : > { %p3046_p13 = scmp.lt.s32.totalorder %s3037_s20, %s3037_s20 }
  0x20   : > { %p3040_p10 = pnand %p3038_p7, %p3002_p9 }
  0x21   : > { %p3047_p0 = por %p3046_p13, %p3045_p12 }
  0x22   : > { %p3041_p11 = pneg %p3040_p10 }
  0x23   : > { %2944 = dma.hbm_to_vmem [thread:$0]  (!%p3262_p8), %s3762_s7, 32768, %s343_s29, [#allocation8], %s3752_s16, %s3752_s16, %s3753_s17  }
  0x24   : > { %p3048_p2 = pnand %p3047_p0, %p3041_p11 }
  0x26   : > { %3051 = shalt.err (!%p3048_p2)
}
  0x27   : > { %s3763_s8 = sld [smem:[#allocation15_spill]]  ;;  %s3291_s29 = sadd.s32 1, %s3146_s24  }
  0x28   : > { %s123_s30 = sadd.s32 1, %s3142_s23  ;;  %s120_s13 = ssub.s32 %s3146_s24, %s3291_s29 }
  0x29   : > { %p130_p9 = scmp.ne.s32.totalorder %s3142_s23, %s3138_s22  ;;  %p121_p3 = scmp.eq.s32.totalorder %s120_s13, 0 }
  0x2a   : > { %p131_p7 = scmp.eq.s32.totalorder %s3146_s24, 0  ;;  %p2954_p10 = scmp.lt.s32.totalorder %s3146_s24, 3 }
  0x2b   : > { %s387_s15 = sand.u32 1, %s3142_s23   ;;  %s2728_s20 = sshll.u32 %s3146_s24, 12 }
  0x2c   : > { %s3302_s18 = scalar_select %p121_p3, %s3142_s23, %s123_s30  }
  0x2d   : > { %2947 = dma.hbm_to_vmem [thread:$0]  (!%p3262_p8), %s3763_s8, 32768, %s356_s14, [#allocation8], %s3752_s16, %s3752_s16, %s3753_s17  }
  0x2e   : > { %p132_p11 = por %p131_p7, %p130_p9  ;;  %s2703_s19 = sshll.u32 %s387_s15, 8 }
  0x2f   : > { %s3308_s7 = scalar_lea.hbm %s3743_s4, %s2728_s20  ;;  %s391_s14 = scalar_lea.vmem [#allocation4], %s2703_s19 }
  0x30   : > { %s399_s16 = sshll.u32 %s391_s14, 4  ;;  %p3310_p8 = pnand %p2954_p10, %p132_p11  ;;  %s3314_s16 = int_to_ptr.vmem [resolvable:$true] %s399_s16 }
  0x31   : > { %s3316_s30 = scalar_lea.sflag [#allocation5], %s387_s15  ;;  %s3052_s24 = scalar_lea.hbm %s3308_s7, 4096 }
  0x32   : > { %p3053_p12 = scmp.ne.s32.totalorder %s3308_s7, %s3052_s24  ;;  %p3054_p13 = pneg %p3310_p8 }
  0x33   : > { %s3057_s19 = scalar_lea.hbm %s3743_s4, 12288  ;;  %p3058_p9 = scmp.lt.s32.totalorder %s3308_s7, %s3743_s4 }
  0x34   : > { %p3055_p0 = pnand %p3054_p13, %p3053_p12  ;;  %p3059_p3 = scmp.lt.s32.totalorder %s3057_s19, %s3052_s24 }
  0x36   : > { %p3056_p2 = pneg %p3055_p0  ;;  %p3060_p7 = por %p3059_p3, %p3058_p9 }
  0x38   : > { %p3061_p10 = pnand %p3060_p7, %p3056_p2 }
  0x3a   : > { %3064 = shalt.err (!%p3061_p10)
}
  0x3b   : > { %s3065_s15 = scalar_lea.vmem %s3314_s16, 4096  ;;  %s3152_s17 = smov [#allocation4]  }
  0x3c   : > { %p3066_p11 = scmp.ne.s32.totalorder %s3314_s16, %s3065_s15  ;;  %s3070_s8 = sshll.u32 %s3152_s17, 4  ;;  %s3071_s8 = int_to_ptr.vmem [resolvable:$false] %s3070_s8 }
  0x3d   : > { %s3072_s20 = scalar_lea.vmem %s3071_s8, 8192  ;;  %p3073_p0 = scmp.lt.s32.totalorder %s3314_s16, %s3071_s8 }
  0x3e   : > { %p3068_p4 = pnand %p3066_p11, %p3054_p13  ;;  %p3074_p1 = scmp.lt.s32.totalorder %s3072_s20, %s3065_s15 }
  0x40   : > { %p3069_p12 = pneg %p3068_p4  ;;  %p3075_p5 = por %p3074_p1, %p3073_p0 }
  0x42   : > { %p3076_p6 = pnand %p3075_p5, %p3069_p12 }
  0x44   : > { %3079 = shalt.err (!%p3076_p6)
}
  0x45   : > { %s3765_s24 = smov 32   ;;  %s3766_s21 = smov 512  }
  0x46   : > { %2951 = dma.hbm_to_vmem [thread:$0]  (!%p3310_p8), %s3308_s7, 4096, %s3314_s16, %s3316_s30, %s3766_s21, %s3766_s21, %s3765_s24  }
  0x47   : > { %p3767_p4 = scmp.ne.s32.totalorder %s3760_s27, 0 }
  0x48   : > { %s413_s17 = sand.u32 (!%p3767_p4), 1, %s3138_s22   ;;  %p3768_p1 = scmp.ne.s32.totalorder (!%p3767_p4), %s3759_s26, 0 }
  0x49   : > { %411 = sbr.rel (%p3767_p4) target bundleno = 1255 (0x4e7), region = 68  ;;  %s2708_s8 = sshll.u32 (!%p3767_p4), %s413_s17, 8 }
  0x4a   : > { %s414_s19 = scalar_lea.sflag (!%p3767_p4), [#allocation5], %s413_s17  ;;  %s3343_s28 = scalar_lea.vmem (!%p3767_p4), [#allocation4], %s2708_s8 }
  0x4e   : > { %3121 = dma.done.wait (%p3768_p1), %s414_s19, 4096  }
  0x4f   : > { %3123 = vsyncadd (%p3768_p1), %s414_s19, 4294963200  ;;  %p3769_p5 = scmp.eq.s32.totalorder %s3241_s25, 0 }
  0x51   : > { %3125 = dma.done.wait (%p3769_p5), [#allocation8], 65536   ;;  %p3770_p6 = pmov %p3769_p5 }
  0x52   : > { %s2711_s7 = sshll.u32 %s3241_s25, 1  ;;  %p3771_p13 = scmp.ne.s32.totalorder %s3241_s25, 0 }
  0x53   : > { %3127 = vsyncadd (%p3770_p6), [#allocation8], 4294901760  ;;  %p467_p8 = scmp.lt.s32.totalorder %s2711_s7, 5 }
  0x54   : > { %476 = sbr.rel (%p3771_p13) target bundleno = 301 (0x12d), region = 84 }
  0x55   : > { %s3777_s7 = smov (!%p467_p8, %s2711_s7), 5 }
  0x56   : > { %s2712_s27 = sshll.u32 %s3777_s7, 1 }
  0x57   : > { %s3357_s30 = scalar_lea.vmem %s3740_s1, %s2712_s27 }
  0x59   : > { %v484_v0 = vld [vmem:[%s3741_s2 + $0x28] sm:$0x1]  ;;  %vm513_vm0 = vcmask 1040384   ;;  %v486_v1 = vld [vmem:[%s3741_s2 + $0x38] sm:$0x1]  ;;  %v479_v6 = vld [vmem:[%s3741_s2] sm:$0xff]  ;;  %v489_v10 = vlaneseq }
  0x5a   : > { %v480_v2 = vld [vmem:[%s3741_s2 + $0x8] sm:$0xff]  ;;  %2714 = vmatprep.subr.msk.mxu0 %vm513_vm0, %v484_v0  ;;  %2717 = vmatprep.subr.msk.mxu1 %vm513_vm0, %v486_v1  ;;  %v483_v3 = vld [vmem:[%s3741_s2 + $0x20] sm:$0x1]  ;;  %v485_v4 = vld [vmem:[%s3741_s2 + $0x30] sm:$0x1]  ;;  %v3153_v7 = vmov 0.0  }
  0x5b   : > { %v482_v5 = vld [vmem:[%s3741_s2 + $0x18] sm:$0xff]  ;;  %2715 = vmatpush1.msk.msra.mxu0 %vm513_vm0, %v483_v3  ;;  %2718 = vmatpush1.msk.msra.mxu1 %vm513_vm0, %v485_v4  ;;  %477 = vst [vmem:[#allocation2] sm:$0xff] %v3153_v7  ;;  %v481_v8 = vld [vmem:[%s3741_s2 + $0x10] sm:$0xff]  ;;  %v478_v9 = vld [vmem:[%s3739_s0] sm:$0x3]  ;;  %vm509_vm1 = vcmask 72704  }
  0x5c   : > { %556 = vmatprep.subr.mxu0 %v480_v2  ;;  %627 = vmatprep.subr.mxu1 %v482_v5  ;;  %v490_v11 = vshrl.u32 %v489_v10, 7  ;;  %v487_v14 = vld [vmem:[%s3742_s3] sm:$0xf]  ;;  %v3154_v17 = vmov 1983009808  }
  0x5d   : > { %557 = vmatpush1.msra.mxu0 %v479_v6  ;;  %590 = vmatprep.mubr.f32.mxu0 %v3153_v7  ;;  %v679_v18 = vunpack.c.l.s4 %v3154_v17 }
  0x5e   : > { %628 = vmatpush1.msra.mxu1 %v481_v8  ;;  %661 = vmatprep.mubr.f32.mxu1 %v3153_v7  ;;  %v491_v12 = vsub.s32 0, %v490_v11  ;;  %v499_v13 = vsub.s32 2, %v490_v11  ;;  %v495_v15 = vsub.s32 1, %v490_v11  ;;  %v503_v16 = vsub.s32 3, %v490_v11 }
  0x5f   : > { %2716 = vmatmul.mubr.msk.f32.vlgmr.msra.gmra.mxu0 %vm509_vm1, %v478_v9  ;;  %2719 = vmatmul.mubr.msk.f32.vlgmr.msra.gmra.mxu1 %vm509_vm1, %v478_v9  ;;  %v680_v25 = vunpack.c.0.s8 %v679_v18 }
  0x60   : > { %v492_v19 = vrot.slane %v487_v14, %v491_v12  ;;  %v500_v20 = vrot.slane %v487_v14, %v499_v13  ;;  %v496_v21 = vrot.slane %v487_v14, %v495_v15  ;;  %v504_v22 = vrot.slane %v487_v14, %v503_v16 }
  0x61   : > { %v683_v32 = vsub.s32 %v680_v25, %v490_v11 }
 0x11f   : > { %v592_v23 = vpop.f32.mrf.mxu0  ;;  %v663_v24 = vpop.f32.mrf.mxu1 }
 0x120   : > { %v593_v26 = vadd.f32 %v592_v23, %v492_v19  ;;  %v664_v27 = vadd.f32 %v663_v24, %v500_v20 }
 0x121   : > { %v594_v28 = vpop.f32.mrf.mxu0  ;;  %v665_v29 = vpop.f32.mrf.mxu1 }
 0x122   : > { %v595_v30 = vadd.f32 %v594_v28, %v496_v21  ;;  %v666_v31 = vadd.f32 %v665_v29, %v504_v22  ;;  %v668_v33 = vmax.f32 %v593_v26, 0.0  ;;  %v670_v34 = vmax.f32 %v664_v27, 0.0 }
 0x124   : > { %v669_v35 = vmax.f32 %v595_v30, 0.0  ;;  %v671_v36 = vmax.f32 %v666_v31, 0.0 }
 0x126   : > { %v676_v37 = vcombine.low %v668_v33, %v669_v35  ;;  %v677_v38 = vcombine.low %v670_v34, %v671_v36 }
 0x128   : > { %v684_v39 = vrot.slane %v676_v37, %v683_v32  ;;  %v691_v40 = vrot.slane %v677_v38, %v683_v32 }
 0x12a   : > { %v692_v41 = vcombine.low %v684_v39, %v691_v40 }
 0x12c   : > { %694 = vst [vmem:[#allocation3] sm:$0xff] %v692_v41 }
 0x12d PF: > { %v708_v42 = vld [vmem:[%s3343_s28 + $0x68] sm:$0xff]  ;;  %v710_v43 = vld [vmem:[%s3343_s28 + $0x78] sm:$0xff]  ;;  %v707_v44 = vld [vmem:[%s3343_s28 + $0x60] sm:$0xff]  ;;  %p2721_p2 = scmp.ne.s32.totalorder %s3241_s25, 2 }
 0x12e   : > { %v2799_v45 = vunpack.c.h.s8.bf16 %v708_v42  ;;  %v2803_v46 = vunpack.c.l.s8.bf16 %v708_v42  ;;  %v2863_v47 = vunpack.c.h.s8.bf16 %v710_v43  ;;  %v2867_v48 = vunpack.c.l.s8.bf16 %v710_v43  ;;  %v709_v49 = vld [vmem:[%s3343_s28 + $0x70] sm:$0xff]  ;;  %v704_v52 = vld [vmem:[%s3343_s28 + $0x48] sm:$0xff]  ;;  %v706_v53 = vld [vmem:[%s3343_s28 + $0x58] sm:$0xff] }
 0x12f   : > { %v2801_v50 = vunpack.c.h.s8.bf16 %v707_v44  ;;  %v2865_v51 = vunpack.c.h.s8.bf16 %v709_v49  ;;  %v2805_v54 = vunpack.c.l.s8.bf16 %v707_v44  ;;  %v2869_v55 = vunpack.c.l.s8.bf16 %v709_v49  ;;  %v703_v58 = vld [vmem:[%s3343_s28 + $0x40] sm:$0xff]  ;;  %v705_v59 = vld [vmem:[%s3343_s28 + $0x50] sm:$0xff]  ;;  %v700_v0 = vld [vmem:[%s3343_s28 + $0x28] sm:$0xff] }
 0x130   : > { %2800 = vmatprep.subr.bf16.mxu0 %v2799_v45  ;;  %2864 = vmatprep.subr.bf16.mxu1 %v2863_v47  ;;  %v2807_v56 = vunpack.c.h.s8.bf16 %v704_v52  ;;  %v2871_v57 = vunpack.c.h.s8.bf16 %v706_v53  ;;  %v2809_v60 = vunpack.c.h.s8.bf16 %v703_v58  ;;  %v2873_v61 = vunpack.c.h.s8.bf16 %v705_v59  ;;  %v702_v1 = vld [vmem:[%s3343_s28 + $0x38] sm:$0xff]  ;;  %v699_v6 = vld [vmem:[%s3343_s28 + $0x20] sm:$0xff]  ;;  %v701_v7 = vld [vmem:[%s3343_s28 + $0x30] sm:$0xff] }
 0x131   : > { %2802 = vmatpush1.bf16.msra.mxu0 %v2801_v50  ;;  %2866 = vmatpush1.bf16.msra.mxu1 %v2865_v51  ;;  %v2811_v62 = vunpack.c.l.s8.bf16 %v704_v52  ;;  %v2875_v63 = vunpack.c.l.s8.bf16 %v706_v53  ;;  %v2813_v2 = vunpack.c.l.s8.bf16 %v703_v58  ;;  %v2877_v3 = vunpack.c.l.s8.bf16 %v705_v59  ;;  %v3404_v8 = vld.sshfl [vmem:[%s3357_s30] sm:$0x33 pattern:$0x76325410]  ;;  %v696_v14 = vld [vmem:[%s3343_s28 + $0x8] sm:$0xff]  ;;  %v698_v15 = vld [vmem:[%s3343_s28 + $0x18] sm:$0xff] }
 0x132   : > { %2804 = vmatprep.subr.bf16.mxu0 %v2803_v46  ;;  %2868 = vmatprep.subr.bf16.mxu1 %v2867_v48  ;;  %v2815_v4 = vunpack.c.h.s8.bf16 %v700_v0  ;;  %v2879_v5 = vunpack.c.h.s8.bf16 %v702_v1  ;;  %v2817_v9 = vunpack.c.h.s8.bf16 %v699_v6  ;;  %v2881_v10 = vunpack.c.h.s8.bf16 %v701_v7  ;;  %v695_v20 = vld [vmem:[%s3343_s28] sm:$0xff]  ;;  %v697_v21 = vld [vmem:[%s3343_s28 + $0x10] sm:$0xff]  ;;  %v724_v26 = vld [vmem:[%s3343_s28 + $0xe8] sm:$0xff] }
 0x133   : > { %v2819_v11 = vunpack.c.l.s8.bf16 %v700_v0  ;;  %v2883_v12 = vunpack.c.l.s8.bf16 %v702_v1  ;;  %v993_v13 = vcombine.high %v3404_v8, %v3404_v8  ;;  %v2821_v16 = vunpack.c.l.s8.bf16 %v699_v6  ;;  %v726_v27 = vld [vmem:[%s3343_s28 + $0xf8] sm:$0xff]  ;;  %v723_v32 = vld [vmem:[%s3343_s28 + $0xe0] sm:$0xff]  ;;  %v725_v33 = vld [vmem:[%s3343_s28 + $0xf0] sm:$0xff] }
 0x134   : > { %v2885_v17 = vunpack.c.l.s8.bf16 %v701_v7  ;;  %v2823_v18 = vunpack.c.h.s8.bf16 %v696_v14  ;;  %v2887_v19 = vunpack.c.h.s8.bf16 %v698_v15  ;;  %v2825_v22 = vunpack.c.h.s8.bf16 %v695_v20  ;;  %v720_v38 = vld [vmem:[%s3343_s28 + $0xc8] sm:$0xff]  ;;  %v722_v39 = vld [vmem:[%s3343_s28 + $0xd8] sm:$0xff]  ;;  %v719_v44 = vld [vmem:[%s3343_s28 + $0xc0] sm:$0xff] }
 0x135   : > { %2806 = vmatpush1.bf16.msra.mxu0 %v2805_v54  ;;  %2870 = vmatpush1.bf16.msra.mxu1 %v2869_v55  ;;  %v2889_v23 = vunpack.c.h.s8.bf16 %v697_v21  ;;  %v2827_v24 = vunpack.c.l.s8.bf16 %v696_v14  ;;  %v2891_v25 = vunpack.c.l.s8.bf16 %v698_v15  ;;  %v2829_v28 = vunpack.c.l.s8.bf16 %v695_v20  ;;  %v721_v45 = vld [vmem:[%s3343_s28 + $0xd0] sm:$0xff]  ;;  %v716_v50 = vld [vmem:[%s3343_s28 + $0xa8] sm:$0xff]  ;;  %v718_v51 = vld [vmem:[%s3343_s28 + $0xb8] sm:$0xff] }
 0x136   : > { %2808 = vmatprep.subr.bf16.mxu0 %v2807_v56  ;;  %2872 = vmatprep.subr.bf16.mxu1 %v2871_v57  ;;  %v2893_v29 = vunpack.c.l.s8.bf16 %v697_v21  ;;  %v2831_v30 = vunpack.c.h.s8.bf16 %v724_v26  ;;  %v2895_v31 = vunpack.c.h.s8.bf16 %v726_v27  ;;  %v2833_v34 = vunpack.c.h.s8.bf16 %v723_v32  ;;  %v715_v56 = vld [vmem:[%s3343_s28 + $0xa0] sm:$0xff]  ;;  %v717_v57 = vld [vmem:[%s3343_s28 + $0xb0] sm:$0xff] }
 0x137   : > { %1060 = vmatprep.mubr.f32.mxu0 %v993_v13  ;;  %1131 = vmatprep.mubr.f32.mxu1 %v993_v13  ;;  %v2897_v35 = vunpack.c.h.s8.bf16 %v725_v33  ;;  %v2835_v36 = vunpack.c.l.s8.bf16 %v724_v26  ;;  %v2899_v37 = vunpack.c.l.s8.bf16 %v726_v27  ;;  %v2837_v40 = vunpack.c.l.s8.bf16 %v723_v32 }
 0x138   : > { %v2901_v41 = vunpack.c.l.s8.bf16 %v725_v33  ;;  %v2839_v42 = vunpack.c.h.s8.bf16 %v720_v38  ;;  %v2903_v43 = vunpack.c.h.s8.bf16 %v722_v39  ;;  %v2841_v46 = vunpack.c.h.s8.bf16 %v719_v44 }
 0x139   : > { %2810 = vmatpush1.bf16.msra.mxu0 %v2809_v60  ;;  %2874 = vmatpush1.bf16.msra.mxu1 %v2873_v61  ;;  %v2905_v47 = vunpack.c.h.s8.bf16 %v721_v45  ;;  %v2843_v48 = vunpack.c.l.s8.bf16 %v720_v38  ;;  %v2907_v49 = vunpack.c.l.s8.bf16 %v722_v39  ;;  %v2845_v52 = vunpack.c.l.s8.bf16 %v719_v44 }
 0x13a   : > { %2812 = vmatprep.subr.bf16.mxu0 %v2811_v62  ;;  %2876 = vmatprep.subr.bf16.mxu1 %v2875_v63  ;;  %v2909_v53 = vunpack.c.l.s8.bf16 %v721_v45  ;;  %v2847_v54 = vunpack.c.h.s8.bf16 %v716_v50  ;;  %v2911_v55 = vunpack.c.h.s8.bf16 %v718_v51  ;;  %v2849_v58 = vunpack.c.h.s8.bf16 %v715_v56  ;;  %v712_v62 = vld [vmem:[%s3343_s28 + $0x88] sm:$0xff]  ;;  %v714_v63 = vld [vmem:[%s3343_s28 + $0x98] sm:$0xff] }
 0x13b   : > { %v2913_v59 = vunpack.c.h.s8.bf16 %v717_v57  ;;  %v2851_v60 = vunpack.c.l.s8.bf16 %v716_v50  ;;  %v2915_v61 = vunpack.c.l.s8.bf16 %v718_v51  ;;  %v2853_v0 = vunpack.c.l.s8.bf16 %v715_v56 }
 0x13c   : > { %v2917_v1 = vunpack.c.l.s8.bf16 %v717_v57  ;;  %v3155_v13 = vmov 1983009808   ;;  %v1147_v15 = vlaneseq }
 0x13d   : > { %2814 = vmatpush1.bf16.msra.mxu0 %v2813_v2  ;;  %2878 = vmatpush1.bf16.msra.mxu1 %v2877_v3  ;;  %v2855_v2 = vunpack.c.h.s8.bf16 %v712_v62  ;;  %v2919_v3 = vunpack.c.h.s8.bf16 %v714_v63  ;;  %v1145_v14 = vunpack.c.l.s4 %v3155_v13 }
 0x13e   : > { %2816 = vmatprep.subr.bf16.mxu0 %v2815_v4  ;;  %2880 = vmatprep.subr.bf16.mxu1 %v2879_v5  ;;  %v711_v4 = vld [vmem:[%s3343_s28 + $0x80] sm:$0xff]  ;;  %v713_v5 = vld [vmem:[%s3343_s28 + $0x90] sm:$0xff] }
 0x13f   : > { %v2857_v6 = vunpack.c.h.s8.bf16 %v711_v4  ;;  %v2921_v7 = vunpack.c.h.s8.bf16 %v713_v5 }
 0x141   : > { %2818 = vmatpush1.bf16.msra.mxu0 %v2817_v9  ;;  %2882 = vmatpush1.bf16.msra.mxu1 %v2881_v10  ;;  %v2859_v9 = vunpack.c.l.s8.bf16 %v712_v62  ;;  %v2923_v10 = vunpack.c.l.s8.bf16 %v714_v63 }
 0x142   : > { %2820 = vmatprep.subr.bf16.mxu0 %v2819_v11  ;;  %2884 = vmatprep.subr.bf16.mxu1 %v2883_v12  ;;  %v2861_v11 = vunpack.c.l.s8.bf16 %v711_v4  ;;  %v2925_v12 = vunpack.c.l.s8.bf16 %v713_v5 }
 0x145   : > { %2822 = vmatpush1.bf16.msra.mxu0 %v2821_v16  ;;  %2886 = vmatpush1.bf16.msra.mxu1 %v2885_v17  ;;  %v1146_v16 = vunpack.c.0.s8 %v1145_v14  ;;  %v3430_v17 = vshrl.u32 %v1147_v15, 7 }
 0x146   : > { %2824 = vmatprep.subr.bf16.mxu0 %v2823_v18  ;;  %2888 = vmatprep.subr.bf16.mxu1 %v2887_v19 }
 0x147   : > { %v3433_v20 = vsub.s32 %v1146_v16, %v3430_v17 }
 0x149   : > { %2826 = vmatpush1.bf16.msra.mxu0 %v2825_v22  ;;  %2890 = vmatpush1.bf16.msra.mxu1 %v2889_v23 }
 0x14a   : > { %2828 = vmatprep.subr.bf16.mxu0 %v2827_v24  ;;  %2892 = vmatprep.subr.bf16.mxu1 %v2891_v25 }
 0x14d   : > { %2830 = vmatpush1.bf16.msra.mxu0 %v2829_v28  ;;  %2894 = vmatpush1.bf16.msra.mxu1 %v2893_v29 }
 0x14e   : > { %2832 = vmatprep.subr.bf16.mxu0 %v2831_v30  ;;  %2896 = vmatprep.subr.bf16.mxu1 %v2895_v31 }
 0x151   : > { %2834 = vmatpush2.bf16.msra.mxu0 %v2833_v34  ;;  %2898 = vmatpush2.bf16.msra.mxu1 %v2897_v35 }
 0x152   : > { %2836 = vmatprep.subr.bf16.mxu0 %v2835_v36  ;;  %2900 = vmatprep.subr.bf16.mxu1 %v2899_v37 }
 0x155   : > { %2838 = vmatpush2.bf16.msra.mxu0 %v2837_v40  ;;  %2902 = vmatpush2.bf16.msra.mxu1 %v2901_v41 }
 0x156   : > { %2840 = vmatprep.subr.bf16.mxu0 %v2839_v42  ;;  %2904 = vmatprep.subr.bf16.mxu1 %v2903_v43 }
 0x159   : > { %2842 = vmatpush2.bf16.msra.mxu0 %v2841_v46  ;;  %2906 = vmatpush2.bf16.msra.mxu1 %v2905_v47 }
 0x15a   : > { %2844 = vmatprep.subr.bf16.mxu0 %v2843_v48  ;;  %2908 = vmatprep.subr.bf16.mxu1 %v2907_v49 }
 0x15d   : > { %2846 = vmatpush2.bf16.msra.mxu0 %v2845_v52  ;;  %2910 = vmatpush2.bf16.msra.mxu1 %v2909_v53 }
 0x15e   : > { %2848 = vmatprep.subr.bf16.mxu0 %v2847_v54  ;;  %2912 = vmatprep.subr.bf16.mxu1 %v2911_v55 }
 0x161   : > { %2850 = vmatpush2.bf16.msra.mxu0 %v2849_v58  ;;  %2914 = vmatpush2.bf16.msra.mxu1 %v2913_v59 }
 0x162   : > { %2852 = vmatprep.subr.bf16.mxu0 %v2851_v60  ;;  %2916 = vmatprep.subr.bf16.mxu1 %v2915_v61 }
 0x165   : > { %2854 = vmatpush2.bf16.msra.mxu0 %v2853_v0  ;;  %2918 = vmatpush2.bf16.msra.mxu1 %v2917_v1 }
 0x166   : > { %2856 = vmatprep.subr.bf16.mxu0 %v2855_v2  ;;  %2920 = vmatprep.subr.bf16.mxu1 %v2919_v3 }
 0x169   : > { %2858 = vmatpush2.bf16.msra.mxu0 %v2857_v6  ;;  %2922 = vmatpush2.bf16.msra.mxu1 %v2921_v7 }
 0x16a   : > { %2860 = vmatprep.subr.bf16.mxu0 %v2859_v9  ;;  %2924 = vmatprep.subr.bf16.mxu1 %v2923_v10 }
 0x16d   : > { %2862 = vmatpush2.bf16.msra.mxu0 %v2861_v11  ;;  %2926 = vmatpush2.bf16.msra.mxu1 %v2925_v12 }
 0x170   : > { %1061 = vmatmul.mubr.f32.vlgmr.msra.gmra.mxu0 %v3404_v8  ;;  %1132 = vmatmul.mubr.f32.vlgmr.msra.gmra.mxu1 %v3404_v8  ;;  %v983_v8 = vld [vmem:[#allocation2] sm:$0xff] }
 0x230   : > { %v1062_v18 = vpop.f32.mrf.mxu0  ;;  %v1133_v19 = vpop.f32.mrf.mxu1 }
 0x232   : > { %v1064_v21 = vpop.f32.mrf.mxu0  ;;  %v1135_v22 = vpop.f32.mrf.mxu1 }
 0x233   : > { %v1142_v23 = vcombine.low %v1062_v18, %v1064_v21  ;;  %v1143_v24 = vcombine.low %v1133_v19, %v1135_v22 }
 0x235   : > { %v1150_v25 = vrot.slane %v1142_v23, %v3433_v20  ;;  %v1157_v26 = vrot.slane %v1143_v24, %v3433_v20 }
 0x237   : > { %v1158_v27 = vcombine.low %v1150_v25, %v1157_v26  ;;  %1165 = sbr.rel (%p2721_p2) target bundleno = 1240 (0x4d8), region = 88 }
 0x239   : > { %v1160_v28 = vadd.f32 %v1158_v27, %v983_v8 }
 0x23b   : > { %1161 = vst [vmem:[#allocation2] sm:$0xff] %v1160_v28 }
 0x23c   : > { %v1560_v29 = vld [vmem:[#allocation9 + $0x1e8] sm:$0xff]  ;;  %v1559_v31 = vld [vmem:[#allocation9 + $0x1e0] sm:$0xff]  ;;  %vm2608_vm2 = vcmask 17408  }
 0x23d   : > { %v1688_v30 = vld [vmem:[#allocation9 + $0x5e8] sm:$0xff]  ;;  %1777 = vmatprep.subr.mxu0 %v1560_v29  ;;  %v1687_v32 = vld [vmem:[#allocation9 + $0x5e0] sm:$0xff] }
 0x23e   : > { %1848 = vmatprep.subr.mxu1 %v1688_v30  ;;  %v1556_v33 = vld [vmem:[#allocation9 + $0x1c8] sm:$0xff]  ;;  %1778 = vmatpush1.msra.mxu0 %v1559_v31  ;;  %v1555_v35 = vld [vmem:[#allocation9 + $0x1c0] sm:$0xff] }
 0x23f   : > { %v1684_v34 = vld [vmem:[#allocation9 + $0x5c8] sm:$0xff]  ;;  %1849 = vmatpush1.msra.mxu1 %v1687_v32  ;;  %v1683_v36 = vld [vmem:[#allocation9 + $0x5c0] sm:$0xff]  ;;  %1779 = vmatprep.subr.mxu0 %v1556_v33 }
 0x240   : > { %v1552_v37 = vld [vmem:[#allocation9 + $0x1a8] sm:$0xff]  ;;  %1850 = vmatprep.subr.mxu1 %v1684_v34  ;;  %v1551_v39 = vld [vmem:[#allocation9 + $0x1a0] sm:$0xff]  ;;  %1780 = vmatpush1.msra.mxu0 %v1555_v35 }
 0x241   : > { %v1680_v38 = vld [vmem:[#allocation9 + $0x5a8] sm:$0xff]  ;;  %v1679_v40 = vld [vmem:[#allocation9 + $0x5a0] sm:$0xff]  ;;  %1851 = vmatpush1.msra.mxu1 %v1683_v36  ;;  %1781 = vmatprep.subr.mxu0 %v1552_v37 }
 0x242   : > { %v1548_v41 = vld [vmem:[#allocation9 + $0x188] sm:$0xff]  ;;  %1852 = vmatprep.subr.mxu1 %v1680_v38  ;;  %v1547_v43 = vld [vmem:[#allocation9 + $0x180] sm:$0xff]  ;;  %1782 = vmatpush1.msra.mxu0 %v1551_v39 }
 0x243   : > { %v1676_v42 = vld [vmem:[#allocation9 + $0x588] sm:$0xff]  ;;  %v1675_v44 = vld [vmem:[#allocation9 + $0x580] sm:$0xff]  ;;  %1853 = vmatpush1.msra.mxu1 %v1679_v40  ;;  %1783 = vmatprep.subr.mxu0 %v1548_v41 }
 0x244   : > { %v1544_v45 = vld [vmem:[#allocation9 + $0x168] sm:$0xff]  ;;  %1854 = vmatprep.subr.mxu1 %v1676_v42  ;;  %v1543_v47 = vld [vmem:[#allocation9 + $0x160] sm:$0xff]  ;;  %1784 = vmatpush1.msra.mxu0 %v1547_v43 }
 0x245   : > { %v1672_v46 = vld [vmem:[#allocation9 + $0x568] sm:$0xff]  ;;  %v1671_v48 = vld [vmem:[#allocation9 + $0x560] sm:$0xff]  ;;  %1855 = vmatpush1.msra.mxu1 %v1675_v44  ;;  %1785 = vmatprep.subr.mxu0 %v1544_v45 }
 0x246   : > { %v1540_v49 = vld [vmem:[#allocation9 + $0x148] sm:$0xff]  ;;  %1856 = vmatprep.subr.mxu1 %v1672_v46  ;;  %v1539_v51 = vld [vmem:[#allocation9 + $0x140] sm:$0xff]  ;;  %1786 = vmatpush1.msra.mxu0 %v1543_v47 }
 0x247   : > { %v1668_v50 = vld [vmem:[#allocation9 + $0x548] sm:$0xff]  ;;  %v1667_v52 = vld [vmem:[#allocation9 + $0x540] sm:$0xff]  ;;  %1857 = vmatpush1.msra.mxu1 %v1671_v48  ;;  %1787 = vmatprep.subr.mxu0 %v1540_v49 }
 0x248   : > { %v1536_v53 = vld [vmem:[#allocation9 + $0x128] sm:$0xff]  ;;  %1858 = vmatprep.subr.mxu1 %v1668_v50  ;;  %v1535_v55 = vld [vmem:[#allocation9 + $0x120] sm:$0xff]  ;;  %1788 = vmatpush1.msra.mxu0 %v1539_v51  ;;  %v3439_v51 = vsub.s32 0, %v3430_v17 }
 0x249   : > { %v1664_v54 = vld [vmem:[#allocation9 + $0x528] sm:$0xff]  ;;  %v1663_v56 = vld [vmem:[#allocation9 + $0x520] sm:$0xff]  ;;  %1859 = vmatpush1.msra.mxu1 %v1667_v52  ;;  %1789 = vmatprep.subr.mxu0 %v1536_v53  ;;  %v3442_v52 = vsub.s32 1, %v3430_v17  ;;  %v3445_v53 = vsub.s32 2, %v3430_v17 }
 0x24a   : > { %v1532_v57 = vld [vmem:[#allocation9 + $0x108] sm:$0xff]  ;;  %1860 = vmatprep.subr.mxu1 %v1664_v54  ;;  %v1531_v59 = vld [vmem:[#allocation9 + $0x100] sm:$0xff]  ;;  %1790 = vmatpush1.msra.mxu0 %v1535_v55 }
 0x24b   : > { %v1660_v58 = vld [vmem:[#allocation9 + $0x508] sm:$0xff]  ;;  %v1659_v60 = vld [vmem:[#allocation9 + $0x500] sm:$0xff]  ;;  %1861 = vmatpush1.msra.mxu1 %v1663_v56  ;;  %1791 = vmatprep.subr.mxu0 %v1532_v57  ;;  %v3448_v56 = vsub.s32 3, %v3430_v17 }
 0x24c   : > { %v1528_v61 = vld [vmem:[#allocation9 + $0xe8] sm:$0xff]  ;;  %1862 = vmatprep.subr.mxu1 %v1660_v58  ;;  %v1527_v63 = vld [vmem:[#allocation9 + $0xe0] sm:$0xff]  ;;  %1792 = vmatpush1.msra.mxu0 %v1531_v59 }
 0x24d   : > { %v1656_v62 = vld [vmem:[#allocation9 + $0x4e8] sm:$0xff]  ;;  %v1655_v0 = vld [vmem:[#allocation9 + $0x4e0] sm:$0xff]  ;;  %1863 = vmatpush1.msra.mxu1 %v1659_v60  ;;  %1793 = vmatprep.subr.mxu0 %v1528_v61  ;;  %v1167_v61 = vld [vmem:[%s3744_s5] sm:$0xf] }
 0x24e   : > { %v1524_v1 = vld [vmem:[#allocation9 + $0xc8] sm:$0xff]  ;;  %1864 = vmatprep.subr.mxu1 %v1656_v62  ;;  %v1523_v3 = vld [vmem:[#allocation9 + $0xc0] sm:$0xff]  ;;  %1794 = vmatpush1.msra.mxu0 %v1527_v63  ;;  %v1176_v17 = vrot.slane %v1167_v61, %v3442_v52 }
 0x24f   : > { %v1652_v2 = vld [vmem:[#allocation9 + $0x4c8] sm:$0xff]  ;;  %v1651_v4 = vld [vmem:[#allocation9 + $0x4c0] sm:$0xff]  ;;  %1865 = vmatpush1.msra.mxu1 %v1655_v0  ;;  %1795 = vmatprep.subr.mxu0 %v1524_v1  ;;  %v1172_v0 = vrot.slane %v1167_v61, %v3439_v51  ;;  %v1180_v1 = vrot.slane %v1167_v61, %v3445_v53 }
 0x250   : > { %v1520_v5 = vld [vmem:[#allocation9 + $0xa8] sm:$0xff]  ;;  %1866 = vmatprep.subr.mxu1 %v1652_v2  ;;  %v1519_v7 = vld [vmem:[#allocation9 + $0xa0] sm:$0xff]  ;;  %1796 = vmatpush1.msra.mxu0 %v1523_v3  ;;  %v1204_v2 = vld [vmem:[%s3745_s6] sm:$0xf] }
 0x251   : > { %v1648_v6 = vld [vmem:[#allocation9 + $0x4a8] sm:$0xff]  ;;  %v1647_v9 = vld [vmem:[#allocation9 + $0x4a0] sm:$0xff]  ;;  %1867 = vmatpush1.msra.mxu1 %v1651_v4  ;;  %1797 = vmatprep.subr.mxu0 %v1520_v5  ;;  %v1184_v5 = vrot.slane %v1167_v61, %v3448_v56 }
 0x252   : > { %v1516_v10 = vld [vmem:[#allocation9 + $0x88] sm:$0xff]  ;;  %1868 = vmatprep.subr.mxu1 %v1648_v6  ;;  %v1515_v12 = vld [vmem:[#allocation9 + $0x80] sm:$0xff]  ;;  %1798 = vmatpush1.msra.mxu0 %v1519_v7  ;;  %v1209_v6 = vrot.slane %v1204_v2, %v3439_v51  ;;  %v1213_v7 = vrot.slane %v1204_v2, %v3442_v52 }
 0x253   : > { %v1644_v11 = vld [vmem:[#allocation9 + $0x488] sm:$0xff]  ;;  %v1643_v13 = vld [vmem:[#allocation9 + $0x480] sm:$0xff]  ;;  %1869 = vmatpush1.msra.mxu1 %v1647_v9  ;;  %1799 = vmatprep.subr.mxu0 %v1516_v10 }
 0x254   : > { %v1512_v14 = vld [vmem:[#allocation9 + $0x68] sm:$0xff]  ;;  %1870 = vmatprep.subr.mxu1 %v1644_v11  ;;  %v1511_v16 = vld [vmem:[#allocation9 + $0x60] sm:$0xff]  ;;  %1800 = vmatpush1.msra.mxu0 %v1515_v12  ;;  %v1185_v11 = vcombine.low %v1172_v0, %v1176_v17  ;;  %v1217_v12 = vrot.slane %v1204_v2, %v3445_v53 }
 0x255   : > { %v1640_v15 = vld [vmem:[#allocation9 + $0x468] sm:$0xff]  ;;  %v1639_v18 = vld [vmem:[#allocation9 + $0x460] sm:$0xff]  ;;  %1871 = vmatpush1.msra.mxu1 %v1643_v13  ;;  %1801 = vmatprep.subr.mxu0 %v1512_v14  ;;  %v1221_v13 = vrot.slane %v1204_v2, %v3448_v56 }
 0x256   : > { %v1508_v19 = vld [vmem:[#allocation9 + $0x48] sm:$0xff]  ;;  %1872 = vmatprep.subr.mxu1 %v1640_v15  ;;  %v1507_v22 = vld [vmem:[#allocation9 + $0x40] sm:$0xff]  ;;  %1802 = vmatpush1.msra.mxu0 %v1511_v16  ;;  %v1186_v16 = vcombine.low %v1180_v1, %v1184_v5  ;;  %v1690_v5 = vld [vmem:[#allocation9 + $0x5f8] sm:$0xff] }
 0x257   : > { %v1636_v21 = vld [vmem:[#allocation9 + $0x448] sm:$0xff]  ;;  %v1635_v23 = vld [vmem:[#allocation9 + $0x440] sm:$0xff]  ;;  %1873 = vmatpush1.msra.mxu1 %v1639_v18  ;;  %1803 = vmatprep.subr.mxu0 %v1508_v19  ;;  %v1222_v18 = vcombine.low %v1209_v6, %v1213_v7  ;;  %v1561_v6 = vld [vmem:[#allocation9 + $0x1f0] sm:$0xff] }
 0x258   : > { %v1504_v24 = vld [vmem:[#allocation9 + $0x28] sm:$0xff]  ;;  %1874 = vmatprep.subr.mxu1 %v1636_v21  ;;  %v1503_v26 = vld [vmem:[#allocation9 + $0x20] sm:$0xff]  ;;  %1804 = vmatpush1.msra.mxu0 %v1507_v22  ;;  %v1193_v22 = vrot.slane %v1185_v11, %v3433_v20  ;;  %v1689_v7 = vld [vmem:[#allocation9 + $0x5f0] sm:$0xff] }
 0x259   : > { %v1632_v25 = vld [vmem:[#allocation9 + $0x428] sm:$0xff]  ;;  %v1631_v8 = vld [vmem:[#allocation9 + $0x420] sm:$0xff]  ;;  %1875 = vmatpush1.msra.mxu1 %v1635_v23  ;;  %1805 = vmatprep.subr.mxu0 %v1504_v24  ;;  %v1223_v23 = vcombine.low %v1217_v12, %v1221_v13  ;;  %v1557_v11 = vld [vmem:[#allocation9 + $0x1d0] sm:$0xff] }
 0x25a   : > { %v1500_v27 = vld [vmem:[#allocation9 + $0x8] sm:$0xff]  ;;  %1876 = vmatprep.subr.mxu1 %v1632_v25  ;;  %v1499_v29 = vld [vmem:[#allocation9] sm:$0xff]  ;;  %1806 = vmatpush1.msra.mxu0 %v1503_v26  ;;  %v1200_v26 = vrot.slane %v1186_v16, %v3433_v20  ;;  %v1685_v12 = vld [vmem:[#allocation9 + $0x5d0] sm:$0xff] }
 0x25b   : > { %v1628_v28 = vld [vmem:[#allocation9 + $0x408] sm:$0xff]  ;;  %v1627_v30 = vld [vmem:[#allocation9 + $0x400] sm:$0xff]  ;;  %1877 = vmatpush1.msra.mxu1 %v1631_v8  ;;  %1807 = vmatprep.subr.mxu0 %v1500_v27  ;;  %v1230_v8 = vrot.slane %v1222_v18, %v3433_v20  ;;  %v1554_v13 = vld [vmem:[#allocation9 + $0x1b8] sm:$0xff] }
 0x25c   : > { %v1624_v31 = vld [vmem:[#allocation9 + $0x3e8] sm:$0xff]  ;;  %1878 = vmatprep.subr.mxu1 %v1628_v28  ;;  %v1623_v33 = vld [vmem:[#allocation9 + $0x3e0] sm:$0xff]  ;;  %1808 = vmatpush1.msra.mxu0 %v1499_v29  ;;  %v1166_v29 = vld [vmem:[#allocation2] sm:$0xff] }
 0x25d   : > { %v1752_v32 = vld [vmem:[#allocation9 + $0x7e8] sm:$0xff]  ;;  %v1751_v34 = vld [vmem:[#allocation9 + $0x7e0] sm:$0xff]  ;;  %1879 = vmatpush1.msra.mxu1 %v1627_v30  ;;  %1809 = vmatprep.subr.mxu0 %v1624_v31  ;;  %v1237_v30 = vrot.slane %v1223_v23, %v3433_v20  ;;  %v1681_v16 = vld [vmem:[#allocation9 + $0x5b0] sm:$0xff] }
 0x25e   : > { %v1620_v35 = vld [vmem:[#allocation9 + $0x3c8] sm:$0xff]  ;;  %1880 = vmatprep.subr.mxu1 %v1752_v32  ;;  %v1619_v37 = vld [vmem:[#allocation9 + $0x3c0] sm:$0xff]  ;;  %1810 = vmatpush2.msra.mxu0 %v1623_v33  ;;  %v1201_v33 = vcombine.low %v1193_v22, %v1200_v26  ;;  %v1550_v18 = vld [vmem:[#allocation9 + $0x198] sm:$0xff] }
 0x25f   : > { %v1748_v36 = vld [vmem:[#allocation9 + $0x7c8] sm:$0xff]  ;;  %v1747_v38 = vld [vmem:[#allocation9 + $0x7c0] sm:$0xff]  ;;  %1881 = vmatpush2.msra.mxu1 %v1751_v34  ;;  %1811 = vmatprep.subr.mxu0 %v1620_v35  ;;  %v1677_v22 = vld [vmem:[#allocation9 + $0x590] sm:$0xff] }
 0x260   : > { %v1616_v39 = vld [vmem:[#allocation9 + $0x3a8] sm:$0xff]  ;;  %1882 = vmatprep.subr.mxu1 %v1748_v36  ;;  %v1615_v41 = vld [vmem:[#allocation9 + $0x3a0] sm:$0xff]  ;;  %1812 = vmatpush2.msra.mxu0 %v1619_v37  ;;  %v1238_v36 = vcombine.low %v1230_v8, %v1237_v30  ;;  %v1546_v23 = vld [vmem:[#allocation9 + $0x178] sm:$0xff] }
 0x261   : > { %v1744_v40 = vld [vmem:[#allocation9 + $0x7a8] sm:$0xff]  ;;  %v1743_v42 = vld [vmem:[#allocation9 + $0x7a0] sm:$0xff]  ;;  %1883 = vmatpush2.msra.mxu1 %v1747_v38  ;;  %1813 = vmatprep.subr.mxu0 %v1616_v39  ;;  %v1203_v39 = vmul.f32 %v1201_v33, %v1166_v29  ;;  %v1673_v26 = vld [vmem:[#allocation9 + $0x570] sm:$0xff] }
 0x262   : > { %v1612_v43 = vld [vmem:[#allocation9 + $0x388] sm:$0xff]  ;;  %1884 = vmatprep.subr.mxu1 %v1744_v40  ;;  %v1611_v45 = vld [vmem:[#allocation9 + $0x380] sm:$0xff]  ;;  %1814 = vmatpush2.msra.mxu0 %v1615_v41  ;;  %v1542_v8 = vld [vmem:[#allocation9 + $0x158] sm:$0xff] }
 0x263   : > { %v1740_v44 = vld [vmem:[#allocation9 + $0x788] sm:$0xff]  ;;  %v1739_v46 = vld [vmem:[#allocation9 + $0x780] sm:$0xff]  ;;  %1885 = vmatpush2.msra.mxu1 %v1743_v42  ;;  %1815 = vmatprep.subr.mxu0 %v1612_v43  ;;  %v1669_v29 = vld [vmem:[#allocation9 + $0x550] sm:$0xff] }
 0x264   : > { %v1608_v47 = vld [vmem:[#allocation9 + $0x368] sm:$0xff]  ;;  %1886 = vmatprep.subr.mxu1 %v1740_v44  ;;  %v1607_v49 = vld [vmem:[#allocation9 + $0x360] sm:$0xff]  ;;  %1816 = vmatpush2.msra.mxu0 %v1611_v45  ;;  %v1240_v44 = vadd.f32 %v1238_v36, %v1203_v39  ;;  %v1538_v30 = vld [vmem:[#allocation9 + $0x138] sm:$0xff] }
 0x265   : > { %v1736_v48 = vld [vmem:[#allocation9 + $0x768] sm:$0xff]  ;;  %v1735_v50 = vld [vmem:[#allocation9 + $0x760] sm:$0xff]  ;;  %1887 = vmatpush2.msra.mxu1 %v1739_v46  ;;  %1817 = vmatprep.subr.mxu0 %v1608_v47  ;;  %v1665_v33 = vld [vmem:[#allocation9 + $0x530] sm:$0xff] }
 0x266   : > { %v1604_v54 = vld [vmem:[#allocation9 + $0x348] sm:$0xff]  ;;  %1888 = vmatprep.subr.mxu1 %v1736_v48  ;;  %v1603_v57 = vld [vmem:[#allocation9 + $0x340] sm:$0xff]  ;;  %1818 = vmatpush2.msra.mxu0 %v1607_v49  ;;  %v1241_v49 = vmax.f32 %v1240_v44, 0.0  ;;  %v1533_v36 = vld [vmem:[#allocation9 + $0x110] sm:$0xff] }
 0x267   : > { %v1732_v55 = vld [vmem:[#allocation9 + $0x748] sm:$0xff]  ;;  %v1731_v58 = vld [vmem:[#allocation9 + $0x740] sm:$0xff]  ;;  %1889 = vmatpush2.msra.mxu1 %v1735_v50  ;;  %1819 = vmatprep.subr.mxu0 %v1604_v54  ;;  %v1658_v39 = vld [vmem:[#allocation9 + $0x4f8] sm:$0xff] }
 0x268   : > { %v1600_v59 = vld [vmem:[#allocation9 + $0x328] sm:$0xff]  ;;  %1890 = vmatprep.subr.mxu1 %v1732_v55  ;;  %v1599_v62 = vld [vmem:[#allocation9 + $0x320] sm:$0xff]  ;;  %1820 = vmatpush2.msra.mxu0 %v1603_v57  ;;  %v1525_v44 = vld [vmem:[#allocation9 + $0xd0] sm:$0xff] }
 0x269   : > { %v1728_v60 = vld [vmem:[#allocation9 + $0x728] sm:$0xff]  ;;  %v1727_v63 = vld [vmem:[#allocation9 + $0x720] sm:$0xff]  ;;  %1891 = vmatpush2.msra.mxu1 %v1731_v58  ;;  %1821 = vmatprep.subr.mxu0 %v1600_v59  ;;  %v3469_v58 = vrot.slane %v1241_v49, %v3433_v20  ;;  %v1756_v59 = vcombine.high %v1241_v49, %v1241_v49  ;;  %v1649_v49 = vld [vmem:[#allocation9 + $0x4b0] sm:$0xff] }
 0x26a   : > { %v1596_v3 = vld [vmem:[#allocation9 + $0x308] sm:$0xff]  ;;  %1892 = vmatprep.subr.mxu1 %v1728_v60  ;;  %v1595_v9 = vld [vmem:[#allocation9 + $0x300] sm:$0xff]  ;;  %1822 = vmatpush2.msra.mxu0 %v1599_v62 }
 0x26b   : > { %v1724_v4 = vld [vmem:[#allocation9 + $0x708] sm:$0xff]  ;;  %v1723_v10 = vld [vmem:[#allocation9 + $0x700] sm:$0xff]  ;;  %1893 = vmatpush2.msra.mxu1 %v1727_v63  ;;  %1823 = vmatprep.subr.mxu0 %v1596_v3  ;;  %v3473_v0 = vcombine.high %v3469_v58, %v3469_v58  ;;  %v3476_v17 = vrot.slane %v1756_v59, %v3433_v20  ;;  %v1514_v59 = vld [vmem:[#allocation9 + $0x78] sm:$0xff] }
 0x26c   : > { %v1592_v14 = vld [vmem:[#allocation9 + $0x2e8] sm:$0xff]  ;;  %1894 = vmatprep.subr.mxu1 %v1724_v4  ;;  %v1591_v19 = vld [vmem:[#allocation9 + $0x2e0] sm:$0xff]  ;;  %1824 = vmatpush2.msra.mxu0 %v1595_v9  ;;  %v1562_v4 = vld [vmem:[#allocation9 + $0x1f8] sm:$0xff] }
 0x26d   : > { %v1720_v15 = vld [vmem:[#allocation9 + $0x6e8] sm:$0xff]  ;;  %v1719_v21 = vld [vmem:[#allocation9 + $0x6e0] sm:$0xff]  ;;  %1895 = vmatpush2.msra.mxu1 %v1723_v10  ;;  %1825 = vmatprep.subr.mxu0 %v1592_v14  ;;  %v3480_v3 = vcombine.high %v3476_v17, %v3476_v17  ;;  %v1558_v9 = vld [vmem:[#allocation9 + $0x1d8] sm:$0xff] }
 0x26e   : > { %v1588_v24 = vld [vmem:[#allocation9 + $0x2c8] sm:$0xff]  ;;  %1896 = vmatprep.subr.mxu1 %v1720_v15  ;;  %v1587_v27 = vld [vmem:[#allocation9 + $0x2c0] sm:$0xff]  ;;  %1826 = vmatpush2.msra.mxu0 %v1591_v19  ;;  %v1686_v10 = vld [vmem:[#allocation9 + $0x5d8] sm:$0xff] }
 0x26f   : > { %v1716_v25 = vld [vmem:[#allocation9 + $0x6c8] sm:$0xff]  ;;  %v1715_v28 = vld [vmem:[#allocation9 + $0x6c0] sm:$0xff]  ;;  %1897 = vmatpush2.msra.mxu1 %v1719_v21  ;;  %1827 = vmatprep.subr.mxu0 %v1588_v24  ;;  %v1682_v14 = vld [vmem:[#allocation9 + $0x5b8] sm:$0xff] }
 0x270   : > { %v1584_v31 = vld [vmem:[#allocation9 + $0x2a8] sm:$0xff]  ;;  %1898 = vmatprep.subr.mxu1 %v1716_v25  ;;  %v1583_v34 = vld [vmem:[#allocation9 + $0x2a0] sm:$0xff]  ;;  %1828 = vmatpush2.msra.mxu0 %v1587_v27  ;;  %v1553_v15 = vld [vmem:[#allocation9 + $0x1b0] sm:$0xff] }
 0x271   : > { %v1712_v32 = vld [vmem:[#allocation9 + $0x6a8] sm:$0xff]  ;;  %v1711_v35 = vld [vmem:[#allocation9 + $0x6a0] sm:$0xff]  ;;  %1899 = vmatpush2.msra.mxu1 %v1715_v28  ;;  %1829 = vmatprep.subr.mxu0 %v1584_v31  ;;  %v1678_v19 = vld [vmem:[#allocation9 + $0x598] sm:$0xff] }
 0x272   : > { %v1580_v37 = vld [vmem:[#allocation9 + $0x288] sm:$0xff]  ;;  %1900 = vmatprep.subr.mxu1 %v1712_v32  ;;  %v1579_v40 = vld [vmem:[#allocation9 + $0x280] sm:$0xff]  ;;  %1830 = vmatpush2.msra.mxu0 %v1583_v34  ;;  %v1549_v21 = vld [vmem:[#allocation9 + $0x190] sm:$0xff] }
 0x273   : > { %v1708_v38 = vld [vmem:[#allocation9 + $0x688] sm:$0xff]  ;;  %v1707_v41 = vld [vmem:[#allocation9 + $0x680] sm:$0xff]  ;;  %1901 = vmatpush2.msra.mxu1 %v1711_v35  ;;  %1831 = vmatprep.subr.mxu0 %v1580_v37  ;;  %v1674_v24 = vld [vmem:[#allocation9 + $0x578] sm:$0xff] }
 0x274   : > { %v1576_v42 = vld [vmem:[#allocation9 + $0x268] sm:$0xff]  ;;  %1902 = vmatprep.subr.mxu1 %v1708_v38  ;;  %v1575_v45 = vld [vmem:[#allocation9 + $0x260] sm:$0xff]  ;;  %1832 = vmatpush2.msra.mxu0 %v1579_v40  ;;  %v1545_v25 = vld [vmem:[#allocation9 + $0x170] sm:$0xff] }
 0x275   : > { %v1704_v43 = vld [vmem:[#allocation9 + $0x668] sm:$0xff]  ;;  %v1703_v46 = vld [vmem:[#allocation9 + $0x660] sm:$0xff]  ;;  %1903 = vmatpush2.msra.mxu1 %v1707_v41  ;;  %1833 = vmatprep.subr.mxu0 %v1576_v42  ;;  %v1670_v27 = vld [vmem:[#allocation9 + $0x558] sm:$0xff] }
 0x276   : > { %v1572_v47 = vld [vmem:[#allocation9 + $0x248] sm:$0xff]  ;;  %1904 = vmatprep.subr.mxu1 %v1704_v43  ;;  %v1571_v50 = vld [vmem:[#allocation9 + $0x240] sm:$0xff]  ;;  %1834 = vmatpush2.msra.mxu0 %v1575_v45  ;;  %v1541_v28 = vld [vmem:[#allocation9 + $0x150] sm:$0xff] }
 0x277   : > { %v1700_v48 = vld [vmem:[#allocation9 + $0x648] sm:$0xff]  ;;  %v1699_v54 = vld [vmem:[#allocation9 + $0x640] sm:$0xff]  ;;  %1905 = vmatpush2.msra.mxu1 %v1703_v46  ;;  %1835 = vmatprep.subr.mxu0 %v1572_v47  ;;  %v1666_v31 = vld [vmem:[#allocation9 + $0x538] sm:$0xff] }
 0x278   : > { %v1568_v55 = vld [vmem:[#allocation9 + $0x228] sm:$0xff]  ;;  %1906 = vmatprep.subr.mxu1 %v1700_v48  ;;  %v1567_v60 = vld [vmem:[#allocation9 + $0x220] sm:$0xff]  ;;  %1836 = vmatpush2.msra.mxu0 %v1571_v50  ;;  %v1537_v32 = vld [vmem:[#allocation9 + $0x130] sm:$0xff] }
 0x279   : > { %v1696_v57 = vld [vmem:[#allocation9 + $0x628] sm:$0xff]  ;;  %v1695_v61 = vld [vmem:[#allocation9 + $0x620] sm:$0xff]  ;;  %1907 = vmatpush2.msra.mxu1 %v1699_v54  ;;  %1837 = vmatprep.subr.mxu0 %v1568_v55  ;;  %v1534_v34 = vld [vmem:[#allocation9 + $0x118] sm:$0xff] }
 0x27a   : > { %v1564_v62 = vld [vmem:[#allocation9 + $0x208] sm:$0xff]  ;;  %1908 = vmatprep.subr.mxu1 %v1696_v57  ;;  %v1563_v1 = vld [vmem:[#allocation9 + $0x200] sm:$0xff]  ;;  %1838 = vmatpush2.msra.mxu0 %v1567_v60  ;;  %v1662_v35 = vld [vmem:[#allocation9 + $0x518] sm:$0xff] }
 0x27b   : > { %v1692_v63 = vld [vmem:[#allocation9 + $0x608] sm:$0xff]  ;;  %1909 = vmatpush2.msra.mxu1 %v1695_v61  ;;  %v1691_v2 = vld [vmem:[#allocation9 + $0x600] sm:$0xff]  ;;  %1839 = vmatprep.subr.mxu0 %v1564_v62  ;;  %v1661_v37 = vld [vmem:[#allocation9 + $0x510] sm:$0xff] }
 0x27c   : > { %1910 = vmatprep.subr.mxu1 %v1692_v63  ;;  %1840 = vmatpush2.msra.mxu0 %v1563_v1  ;;  %v1530_v38 = vld [vmem:[#allocation9 + $0xf8] sm:$0xff]  ;;  %v1529_v40 = vld [vmem:[#allocation9 + $0xf0] sm:$0xff] }
 0x27d   : > { %1841 = vmatprep.mubr.f32.mxu0 %v3473_v0  ;;  %1911 = vmatpush2.msra.mxu1 %v1691_v2  ;;  %v1657_v41 = vld [vmem:[#allocation9 + $0x4f0] sm:$0xff]  ;;  %v1526_v42 = vld [vmem:[#allocation9 + $0xd8] sm:$0xff] }
 0x27e   : > { %1912 = vmatprep.mubr.f32.mxu1 %v3480_v3  ;;  %1842 = vmatmul.mubr.f32.vlgmr.msra.gmra.mxu0 %v3469_v58  ;;  %v1654_v43 = vld [vmem:[#allocation9 + $0x4d8] sm:$0xff]  ;;  %v1653_v45 = vld [vmem:[#allocation9 + $0x4d0] sm:$0xff] }
 0x27f   : > { %1913 = vmatmul.mubr.f32.vlgmr.msra.gmra.mxu1 %v3476_v17  ;;  %1919 = vmatprep.subr.mxu0 %v1562_v4  ;;  %v1522_v46 = vld [vmem:[#allocation9 + $0xb8] sm:$0xff]  ;;  %v1521_v48 = vld [vmem:[#allocation9 + $0xb0] sm:$0xff] }
 0x280   : > { %1990 = vmatprep.subr.mxu1 %v1690_v5  ;;  %1920 = vmatpush1.msra.mxu0 %v1561_v6  ;;  %v1650_v47 = vld [vmem:[#allocation9 + $0x4b8] sm:$0xff]  ;;  %v1517_v55 = vld [vmem:[#allocation9 + $0x90] sm:$0xff] }
 0x281   : > { %1991 = vmatpush1.msra.mxu1 %v1689_v7  ;;  %1921 = vmatprep.subr.mxu0 %v1558_v9  ;;  %v1518_v50 = vld [vmem:[#allocation9 + $0x98] sm:$0xff]  ;;  %v1645_v57 = vld [vmem:[#allocation9 + $0x490] sm:$0xff] }
 0x282   : > { %1992 = vmatprep.subr.mxu1 %v1686_v10  ;;  %1922 = vmatpush1.msra.mxu0 %v1557_v11  ;;  %v1646_v54 = vld [vmem:[#allocation9 + $0x498] sm:$0xff]  ;;  %v1513_v61 = vld [vmem:[#allocation9 + $0x70] sm:$0xff] }
 0x283   : > { %1993 = vmatpush1.msra.mxu1 %v1685_v12  ;;  %1923 = vmatprep.subr.mxu0 %v1554_v13  ;;  %v1642_v60 = vld [vmem:[#allocation9 + $0x478] sm:$0xff]  ;;  %v1641_v62 = vld [vmem:[#allocation9 + $0x470] sm:$0xff] }
 0x284   : > { %1994 = vmatprep.subr.mxu1 %v1682_v14  ;;  %1924 = vmatpush1.msra.mxu0 %v1553_v15  ;;  %v1510_v63 = vld [vmem:[#allocation9 + $0x58] sm:$0xff]  ;;  %v1509_v2 = vld [vmem:[#allocation9 + $0x50] sm:$0xff] }
 0x285   : > { %1995 = vmatpush1.msra.mxu1 %v1681_v16  ;;  %1925 = vmatprep.subr.mxu0 %v1550_v18  ;;  %v1638_v1 = vld [vmem:[#allocation9 + $0x458] sm:$0xff]  ;;  %v1637_v4 = vld [vmem:[#allocation9 + $0x450] sm:$0xff] }
 0x286   : > { %1996 = vmatprep.subr.mxu1 %v1678_v19  ;;  %1926 = vmatpush1.msra.mxu0 %v1549_v21  ;;  %v1506_v5 = vld [vmem:[#allocation9 + $0x38] sm:$0xff]  ;;  %v1505_v7 = vld [vmem:[#allocation9 + $0x30] sm:$0xff] }
 0x287   : > { %1997 = vmatpush1.msra.mxu1 %v1677_v22  ;;  %1927 = vmatprep.subr.mxu0 %v1546_v23  ;;  %v1634_v6 = vld [vmem:[#allocation9 + $0x438] sm:$0xff]  ;;  %v1633_v9 = vld [vmem:[#allocation9 + $0x430] sm:$0xff] }
 0x288   : > { %1998 = vmatprep.subr.mxu1 %v1674_v24  ;;  %1928 = vmatpush1.msra.mxu0 %v1545_v25  ;;  %v1502_v10 = vld [vmem:[#allocation9 + $0x18] sm:$0xff]  ;;  %v1501_v12 = vld [vmem:[#allocation9 + $0x10] sm:$0xff] }
 0x289   : > { %1999 = vmatpush1.msra.mxu1 %v1673_v26  ;;  %1929 = vmatprep.subr.mxu0 %v1542_v8  ;;  %v1630_v11 = vld [vmem:[#allocation9 + $0x418] sm:$0xff]  ;;  %v1629_v13 = vld [vmem:[#allocation9 + $0x410] sm:$0xff] }
 0x28a   : > { %2000 = vmatprep.subr.mxu1 %v1670_v27  ;;  %1930 = vmatpush1.msra.mxu0 %v1541_v28  ;;  %v1626_v14 = vld [vmem:[#allocation9 + $0x3f8] sm:$0xff]  ;;  %v1625_v16 = vld [vmem:[#allocation9 + $0x3f0] sm:$0xff] }
 0x28b   : > { %2001 = vmatpush1.msra.mxu1 %v1669_v29  ;;  %1931 = vmatprep.subr.mxu0 %v1538_v30  ;;  %v1754_v15 = vld [vmem:[#allocation9 + $0x7f8] sm:$0xff]  ;;  %v1753_v18 = vld [vmem:[#allocation9 + $0x7f0] sm:$0xff] }
 0x28c   : > { %2002 = vmatprep.subr.mxu1 %v1666_v31  ;;  %1932 = vmatpush1.msra.mxu0 %v1537_v32  ;;  %v1622_v19 = vld [vmem:[#allocation9 + $0x3d8] sm:$0xff]  ;;  %v1621_v22 = vld [vmem:[#allocation9 + $0x3d0] sm:$0xff] }
 0x28d   : > { %2003 = vmatpush1.msra.mxu1 %v1665_v33  ;;  %1933 = vmatprep.subr.mxu0 %v1534_v34  ;;  %v1750_v21 = vld [vmem:[#allocation9 + $0x7d8] sm:$0xff]  ;;  %v1749_v23 = vld [vmem:[#allocation9 + $0x7d0] sm:$0xff] }
 0x28e   : > { %2004 = vmatprep.subr.mxu1 %v1662_v35  ;;  %1934 = vmatpush1.msra.mxu0 %v1533_v36  ;;  %v1618_v24 = vld [vmem:[#allocation9 + $0x3b8] sm:$0xff]  ;;  %v1617_v26 = vld [vmem:[#allocation9 + $0x3b0] sm:$0xff] }
 0x28f   : > { %2005 = vmatpush1.msra.mxu1 %v1661_v37  ;;  %1935 = vmatprep.subr.mxu0 %v1530_v38  ;;  %v1746_v25 = vld [vmem:[#allocation9 + $0x7b8] sm:$0xff]  ;;  %v1745_v8 = vld [vmem:[#allocation9 + $0x7b0] sm:$0xff] }
 0x290   : > { %2006 = vmatprep.subr.mxu1 %v1658_v39  ;;  %1936 = vmatpush1.msra.mxu0 %v1529_v40  ;;  %v1614_v27 = vld [vmem:[#allocation9 + $0x398] sm:$0xff]  ;;  %v1613_v29 = vld [vmem:[#allocation9 + $0x390] sm:$0xff] }
 0x291   : > { %2007 = vmatpush1.msra.mxu1 %v1657_v41  ;;  %1937 = vmatprep.subr.mxu0 %v1526_v42  ;;  %v1742_v28 = vld [vmem:[#allocation9 + $0x798] sm:$0xff]  ;;  %v1741_v30 = vld [vmem:[#allocation9 + $0x790] sm:$0xff] }
 0x292   : > { %2008 = vmatprep.subr.mxu1 %v1654_v43  ;;  %1938 = vmatpush1.msra.mxu0 %v1525_v44  ;;  %v1610_v31 = vld [vmem:[#allocation9 + $0x378] sm:$0xff]  ;;  %v1609_v33 = vld [vmem:[#allocation9 + $0x370] sm:$0xff] }
 0x293   : > { %2009 = vmatpush1.msra.mxu1 %v1653_v45  ;;  %1939 = vmatprep.subr.mxu0 %v1522_v46  ;;  %v1738_v32 = vld [vmem:[#allocation9 + $0x778] sm:$0xff]  ;;  %v1737_v34 = vld [vmem:[#allocation9 + $0x770] sm:$0xff] }
 0x294   : > { %2010 = vmatprep.subr.mxu1 %v1650_v47  ;;  %1940 = vmatpush1.msra.mxu0 %v1521_v48  ;;  %v1606_v35 = vld [vmem:[#allocation9 + $0x358] sm:$0xff]  ;;  %v1605_v37 = vld [vmem:[#allocation9 + $0x350] sm:$0xff] }
 0x295   : > { %2011 = vmatpush1.msra.mxu1 %v1649_v49  ;;  %1941 = vmatprep.subr.mxu0 %v1518_v50  ;;  %v1734_v36 = vld [vmem:[#allocation9 + $0x758] sm:$0xff]  ;;  %v1733_v38 = vld [vmem:[#allocation9 + $0x750] sm:$0xff] }
 0x296   : > { %2012 = vmatprep.subr.mxu1 %v1646_v54  ;;  %1942 = vmatpush1.msra.mxu0 %v1517_v55  ;;  %v1602_v39 = vld [vmem:[#allocation9 + $0x338] sm:$0xff]  ;;  %v1601_v41 = vld [vmem:[#allocation9 + $0x330] sm:$0xff] }
 0x297   : > { %2013 = vmatpush1.msra.mxu1 %v1645_v57  ;;  %1943 = vmatprep.subr.mxu0 %v1514_v59  ;;  %v1730_v40 = vld [vmem:[#allocation9 + $0x738] sm:$0xff]  ;;  %v1729_v42 = vld [vmem:[#allocation9 + $0x730] sm:$0xff] }
 0x298   : > { %2014 = vmatprep.subr.mxu1 %v1642_v60  ;;  %1944 = vmatpush1.msra.mxu0 %v1513_v61  ;;  %v1598_v43 = vld [vmem:[#allocation9 + $0x318] sm:$0xff]  ;;  %v1597_v45 = vld [vmem:[#allocation9 + $0x310] sm:$0xff] }
 0x299   : > { %2015 = vmatpush1.msra.mxu1 %v1641_v62  ;;  %1945 = vmatprep.subr.mxu0 %v1510_v63  ;;  %v1726_v44 = vld [vmem:[#allocation9 + $0x718] sm:$0xff]  ;;  %v1725_v46 = vld [vmem:[#allocation9 + $0x710] sm:$0xff] }
 0x29a   : > { %2016 = vmatprep.subr.mxu1 %v1638_v1  ;;  %1946 = vmatpush1.msra.mxu0 %v1509_v2  ;;  %v1594_v47 = vld [vmem:[#allocation9 + $0x2f8] sm:$0xff]  ;;  %v1593_v49 = vld [vmem:[#allocation9 + $0x2f0] sm:$0xff] }
 0x29b   : > { %2017 = vmatpush1.msra.mxu1 %v1637_v4  ;;  %1947 = vmatprep.subr.mxu0 %v1506_v5  ;;  %v1722_v48 = vld [vmem:[#allocation9 + $0x6f8] sm:$0xff]  ;;  %v1721_v50 = vld [vmem:[#allocation9 + $0x6f0] sm:$0xff] }
 0x29c   : > { %2018 = vmatprep.subr.mxu1 %v1634_v6  ;;  %1948 = vmatpush1.msra.mxu0 %v1505_v7  ;;  %v1590_v54 = vld [vmem:[#allocation9 + $0x2d8] sm:$0xff]  ;;  %v1589_v57 = vld [vmem:[#allocation9 + $0x2d0] sm:$0xff] }
 0x29d   : > { %2019 = vmatpush1.msra.mxu1 %v1633_v9  ;;  %1949 = vmatprep.subr.mxu0 %v1502_v10  ;;  %v1718_v55 = vld [vmem:[#allocation9 + $0x6d8] sm:$0xff]  ;;  %v1717_v59 = vld [vmem:[#allocation9 + $0x6d0] sm:$0xff] }
 0x29e   : > { %2020 = vmatprep.subr.mxu1 %v1630_v11  ;;  %1950 = vmatpush1.msra.mxu0 %v1501_v12  ;;  %v1586_v60 = vld [vmem:[#allocation9 + $0x2b8] sm:$0xff]  ;;  %v1585_v62 = vld [vmem:[#allocation9 + $0x2b0] sm:$0xff] }
 0x29f   : > { %2021 = vmatpush1.msra.mxu1 %v1629_v13  ;;  %1951 = vmatprep.subr.mxu0 %v1626_v14  ;;  %v1714_v61 = vld [vmem:[#allocation9 + $0x6b8] sm:$0xff]  ;;  %v1713_v63 = vld [vmem:[#allocation9 + $0x6b0] sm:$0xff] }
 0x2a0   : > { %2022 = vmatprep.subr.mxu1 %v1754_v15  ;;  %1952 = vmatpush2.msra.mxu0 %v1625_v16  ;;  %v1582_v1 = vld [vmem:[#allocation9 + $0x298] sm:$0xff]  ;;  %v1581_v4 = vld [vmem:[#allocation9 + $0x290] sm:$0xff] }
 0x2a1   : > { %2023 = vmatpush2.msra.mxu1 %v1753_v18  ;;  %1953 = vmatprep.subr.mxu0 %v1622_v19  ;;  %v1710_v2 = vld [vmem:[#allocation9 + $0x698] sm:$0xff]  ;;  %v1709_v5 = vld [vmem:[#allocation9 + $0x690] sm:$0xff] }
 0x2a2   : > { %2024 = vmatprep.subr.mxu1 %v1750_v21  ;;  %1954 = vmatpush2.msra.mxu0 %v1621_v22  ;;  %v1578_v6 = vld [vmem:[#allocation9 + $0x278] sm:$0xff]  ;;  %v1577_v9 = vld [vmem:[#allocation9 + $0x270] sm:$0xff] }
 0x2a3   : > { %2025 = vmatpush2.msra.mxu1 %v1749_v23  ;;  %1955 = vmatprep.subr.mxu0 %v1618_v24  ;;  %v1706_v7 = vld [vmem:[#allocation9 + $0x678] sm:$0xff]  ;;  %v1705_v10 = vld [vmem:[#allocation9 + $0x670] sm:$0xff] }
 0x2a4   : > { %2026 = vmatprep.subr.mxu1 %v1746_v25  ;;  %1956 = vmatpush2.msra.mxu0 %v1617_v26  ;;  %v1574_v11 = vld [vmem:[#allocation9 + $0x258] sm:$0xff]  ;;  %v1573_v13 = vld [vmem:[#allocation9 + $0x250] sm:$0xff]  ;;  %v1304_v25 = vld [vmem:[#allocation7 + $0x1e8] sm:$0xff] }
 0x2a5   : > { %2027 = vmatpush2.msra.mxu1 %v1745_v8  ;;  %1957 = vmatprep.subr.mxu0 %v1614_v27  ;;  %v1702_v12 = vld [vmem:[#allocation9 + $0x658] sm:$0xff]  ;;  %v1701_v14 = vld [vmem:[#allocation9 + $0x650] sm:$0xff]  ;;  %v1432_v26 = vld [vmem:[#allocation7 + $0x5e8] sm:$0xff] }
 0x2a6   : > { %2028 = vmatprep.subr.mxu1 %v1742_v28  ;;  %1958 = vmatpush2.msra.mxu0 %v1613_v29  ;;  %v1570_v15 = vld [vmem:[#allocation9 + $0x238] sm:$0xff]  ;;  %v1569_v18 = vld [vmem:[#allocation9 + $0x230] sm:$0xff]  ;;  %v1303_v8 = vld [vmem:[#allocation7 + $0x1e0] sm:$0xff] }
 0x2a7   : > { %2029 = vmatpush2.msra.mxu1 %v1741_v30  ;;  %1959 = vmatprep.subr.mxu0 %v1610_v31  ;;  %v1698_v16 = vld [vmem:[#allocation9 + $0x638] sm:$0xff]  ;;  %v1697_v19 = vld [vmem:[#allocation9 + $0x630] sm:$0xff]  ;;  %v1431_v27 = vld [vmem:[#allocation7 + $0x5e0] sm:$0xff] }
 0x2a8   : > { %2030 = vmatprep.subr.mxu1 %v1738_v32  ;;  %1960 = vmatpush2.msra.mxu0 %v1609_v33  ;;  %v1566_v21 = vld [vmem:[#allocation9 + $0x218] sm:$0xff]  ;;  %v1565_v23 = vld [vmem:[#allocation9 + $0x210] sm:$0xff]  ;;  %v1300_v28 = vld [vmem:[#allocation7 + $0x1c8] sm:$0xff] }
 0x2a9   : > { %2031 = vmatpush2.msra.mxu1 %v1737_v34  ;;  %1961 = vmatprep.subr.mxu0 %v1606_v35  ;;  %v1694_v22 = vld [vmem:[#allocation9 + $0x618] sm:$0xff]  ;;  %v1693_v24 = vld [vmem:[#allocation9 + $0x610] sm:$0xff]  ;;  %v1428_v29 = vld [vmem:[#allocation7 + $0x5c8] sm:$0xff] }
 0x2aa   : > { %2032 = vmatprep.subr.mxu1 %v1734_v36  ;;  %1962 = vmatpush2.msra.mxu0 %v1605_v37  ;;  %v1299_v30 = vld [vmem:[#allocation7 + $0x1c0] sm:$0xff]  ;;  %v1424_v32 = vld [vmem:[#allocation7 + $0x5a8] sm:$0xff] }
 0x2ab   : > { %2033 = vmatpush2.msra.mxu1 %v1733_v38  ;;  %1963 = vmatprep.subr.mxu0 %v1602_v39  ;;  %v1427_v31 = vld [vmem:[#allocation7 + $0x5c0] sm:$0xff]  ;;  %v1292_v34 = vld [vmem:[#allocation7 + $0x188] sm:$0xff] }
 0x2ac   : > { %2034 = vmatprep.subr.mxu1 %v1730_v40  ;;  %1964 = vmatpush2.msra.mxu0 %v1601_v41  ;;  %v1295_v33 = vld [vmem:[#allocation7 + $0x1a0] sm:$0xff]  ;;  %v1288_v36 = vld [vmem:[#allocation7 + $0x168] sm:$0xff] }
 0x2ad   : > { %2035 = vmatpush2.msra.mxu1 %v1729_v42  ;;  %1965 = vmatprep.subr.mxu0 %v1598_v43  ;;  %v1419_v35 = vld [vmem:[#allocation7 + $0x580] sm:$0xff]  ;;  %v1416_v37 = vld [vmem:[#allocation7 + $0x568] sm:$0xff] }
 0x2ae   : > { %2036 = vmatprep.subr.mxu1 %v1726_v44  ;;  %1966 = vmatpush2.msra.mxu0 %v1597_v45  ;;  %v1287_v38 = vld [vmem:[#allocation7 + $0x160] sm:$0xff]  ;;  %v1284_v40 = vld [vmem:[#allocation7 + $0x148] sm:$0xff] }
 0x2af   : > { %2037 = vmatpush2.msra.mxu1 %v1725_v46  ;;  %1967 = vmatprep.subr.mxu0 %v1594_v47  ;;  %v1415_v39 = vld [vmem:[#allocation7 + $0x560] sm:$0xff]  ;;  %v1412_v41 = vld [vmem:[#allocation7 + $0x548] sm:$0xff] }
 0x2b0   : > { %2038 = vmatprep.subr.mxu1 %v1722_v48  ;;  %1968 = vmatpush2.msra.mxu0 %v1593_v49  ;;  %v1283_v42 = vld [vmem:[#allocation7 + $0x140] sm:$0xff]  ;;  %v1280_v44 = vld [vmem:[#allocation7 + $0x128] sm:$0xff] }
 0x2b1   : > { %2039 = vmatpush2.msra.mxu1 %v1721_v50  ;;  %1969 = vmatprep.subr.mxu0 %v1590_v54  ;;  %v1411_v43 = vld [vmem:[#allocation7 + $0x540] sm:$0xff]  ;;  %v1408_v45 = vld [vmem:[#allocation7 + $0x528] sm:$0xff] }
 0x2b2   : > { %2040 = vmatprep.subr.mxu1 %v1718_v55  ;;  %1970 = vmatpush2.msra.mxu0 %v1589_v57  ;;  %v1279_v46 = vld [vmem:[#allocation7 + $0x120] sm:$0xff]  ;;  %v1276_v48 = vld [vmem:[#allocation7 + $0x108] sm:$0xff] }
 0x2b3   : > { %2041 = vmatpush2.msra.mxu1 %v1717_v59  ;;  %1971 = vmatprep.subr.mxu0 %v1586_v60  ;;  %v1407_v47 = vld [vmem:[#allocation7 + $0x520] sm:$0xff]  ;;  %v1404_v49 = vld [vmem:[#allocation7 + $0x508] sm:$0xff] }
 0x2b4   : > { %2042 = vmatprep.subr.mxu1 %v1714_v61  ;;  %1972 = vmatpush2.msra.mxu0 %v1585_v62  ;;  %v1275_v50 = vld [vmem:[#allocation7 + $0x100] sm:$0xff]  ;;  %v1272_v55 = vld [vmem:[#allocation7 + $0xe8] sm:$0xff] }
 0x2b5   : > { %2043 = vmatpush2.msra.mxu1 %v1713_v63  ;;  %1973 = vmatprep.subr.mxu0 %v1582_v1  ;;  %v1403_v54 = vld [vmem:[#allocation7 + $0x500] sm:$0xff]  ;;  %v1400_v57 = vld [vmem:[#allocation7 + $0x4e8] sm:$0xff] }
 0x2b6   : > { %2044 = vmatprep.subr.mxu1 %v1710_v2  ;;  %1974 = vmatpush2.msra.mxu0 %v1581_v4  ;;  %v1271_v59 = vld [vmem:[#allocation7 + $0xe0] sm:$0xff]  ;;  %v1268_v61 = vld [vmem:[#allocation7 + $0xc8] sm:$0xff] }
 0x2b7   : > { %2045 = vmatpush2.msra.mxu1 %v1709_v5  ;;  %1975 = vmatprep.subr.mxu0 %v1578_v6  ;;  %v1399_v60 = vld [vmem:[#allocation7 + $0x4e0] sm:$0xff]  ;;  %v1396_v62 = vld [vmem:[#allocation7 + $0x4c8] sm:$0xff] }
 0x2b8   : > { %2046 = vmatprep.subr.mxu1 %v1706_v7  ;;  %1976 = vmatpush2.msra.mxu0 %v1577_v9  ;;  %v1267_v63 = vld [vmem:[#allocation7 + $0xc0] sm:$0xff]  ;;  %v1264_v2 = vld [vmem:[#allocation7 + $0xa8] sm:$0xff] }
 0x2b9   : > { %2047 = vmatpush2.msra.mxu1 %v1705_v10  ;;  %1977 = vmatprep.subr.mxu0 %v1574_v11  ;;  %v1395_v1 = vld [vmem:[#allocation7 + $0x4c0] sm:$0xff]  ;;  %v1392_v4 = vld [vmem:[#allocation7 + $0x4a8] sm:$0xff] }
 0x2ba   : > { %2048 = vmatprep.subr.mxu1 %v1702_v12  ;;  %1978 = vmatpush2.msra.mxu0 %v1573_v13  ;;  %v1263_v5 = vld [vmem:[#allocation7 + $0xa0] sm:$0xff]  ;;  %v1260_v7 = vld [vmem:[#allocation7 + $0x88] sm:$0xff] }
 0x2bb   : > { %2049 = vmatpush2.msra.mxu1 %v1701_v14  ;;  %1979 = vmatprep.subr.mxu0 %v1570_v15  ;;  %v1391_v6 = vld [vmem:[#allocation7 + $0x4a0] sm:$0xff]  ;;  %v1388_v9 = vld [vmem:[#allocation7 + $0x488] sm:$0xff] }
 0x2bc   : > { %2050 = vmatprep.subr.mxu1 %v1698_v16  ;;  %1980 = vmatpush2.msra.mxu0 %v1569_v18  ;;  %v1259_v10 = vld [vmem:[#allocation7 + $0x80] sm:$0xff]  ;;  %v1256_v12 = vld [vmem:[#allocation7 + $0x68] sm:$0xff] }
 0x2bd   : > { %2051 = vmatpush2.msra.mxu1 %v1697_v19  ;;  %1981 = vmatprep.subr.mxu0 %v1566_v21  ;;  %v1387_v11 = vld [vmem:[#allocation7 + $0x480] sm:$0xff]  ;;  %v1384_v13 = vld [vmem:[#allocation7 + $0x468] sm:$0xff] }
 0x2be   : > { %2052 = vmatprep.subr.mxu1 %v1694_v22  ;;  %1982 = vmatpush2.msra.mxu0 %v1565_v23  ;;  %v1255_v14 = vld [vmem:[#allocation7 + $0x60] sm:$0xff]  ;;  %v1252_v16 = vld [vmem:[#allocation7 + $0x48] sm:$0xff] }
 0x2bf   : > { %1983 = vmatprep.mubr.f32.mxu0 %v3473_v0  ;;  %2053 = vmatpush2.msra.mxu1 %v1693_v24  ;;  %v1296_v0 = vld [vmem:[#allocation7 + $0x1a8] sm:$0xff]  ;;  %v1383_v15 = vld [vmem:[#allocation7 + $0x460] sm:$0xff] }
 0x2c0   : > { %2054 = vmatprep.mubr.f32.mxu1 %v3480_v3  ;;  %1984 = vmatmul.mubr.f32.vlgmr.msra.gmra.mxu0 %v3469_v58  ;;  %v1423_v3 = vld [vmem:[#allocation7 + $0x5a0] sm:$0xff]  ;;  %v1420_v58 = vld [vmem:[#allocation7 + $0x588] sm:$0xff] }
 0x2c1   : > { %2055 = vmatmul.mubr.f32.vlgmr.msra.gmra.mxu1 %v3476_v17  ;;  %2083 = vmatprep.subr.mxu0 %v1304_v25  ;;  %v1291_v17 = vld [vmem:[#allocation7 + $0x180] sm:$0xff]  ;;  %v1380_v18 = vld [vmem:[#allocation7 + $0x448] sm:$0xff] }
 0x2c2   : > { %2154 = vmatprep.subr.mxu1 %v1432_v26  ;;  %2084 = vmatpush1.msra.mxu0 %v1303_v8  ;;  %v1251_v19 = vld [vmem:[#allocation7 + $0x40] sm:$0xff]  ;;  %v1248_v22 = vld [vmem:[#allocation7 + $0x28] sm:$0xff] }
 0x2c3   : > { %2155 = vmatpush1.msra.mxu1 %v1431_v27  ;;  %2085 = vmatprep.subr.mxu0 %v1300_v28  ;;  %v1379_v21 = vld [vmem:[#allocation7 + $0x440] sm:$0xff]  ;;  %v1376_v23 = vld [vmem:[#allocation7 + $0x428] sm:$0xff] }
 0x2c4   : > { %2156 = vmatprep.subr.mxu1 %v1428_v29  ;;  %2086 = vmatpush1.msra.mxu0 %v1299_v30  ;;  %v1247_v24 = vld [vmem:[#allocation7 + $0x20] sm:$0xff]  ;;  %v1244_v26 = vld [vmem:[#allocation7 + $0x8] sm:$0xff] }
 0x2c5   : > { %2157 = vmatpush1.msra.mxu1 %v1427_v31  ;;  %2087 = vmatprep.subr.mxu0 %v1296_v0  ;;  %v1375_v25 = vld [vmem:[#allocation7 + $0x420] sm:$0xff]  ;;  %v1372_v8 = vld [vmem:[#allocation7 + $0x408] sm:$0xff] }
 0x2c6   : > { %2158 = vmatprep.subr.mxu1 %v1424_v32  ;;  %2088 = vmatpush1.msra.mxu0 %v1295_v33  ;;  %v1243_v27 = vld [vmem:[#allocation7] sm:$0xff]  ;;  %v1368_v29 = vld [vmem:[#allocation7 + $0x3e8] sm:$0xff] }
 0x2c7   : > { %2159 = vmatpush1.msra.mxu1 %v1423_v3  ;;  %2089 = vmatprep.subr.mxu0 %v1292_v34  ;;  %v1371_v28 = vld [vmem:[#allocation7 + $0x400] sm:$0xff]  ;;  %v1496_v30 = vld [vmem:[#allocation7 + $0x7e8] sm:$0xff] }
 0x2c8   : > { %2160 = vmatprep.subr.mxu1 %v1420_v58  ;;  %2090 = vmatpush1.msra.mxu0 %v1291_v17  ;;  %v1367_v31 = vld [vmem:[#allocation7 + $0x3e0] sm:$0xff]  ;;  %v1364_v32 = vld [vmem:[#allocation7 + $0x3c8] sm:$0xff] }
 0x2c9   : > { %2161 = vmatpush1.msra.mxu1 %v1419_v35  ;;  %2091 = vmatprep.subr.mxu0 %v1288_v36  ;;  %v1495_v0 = vld [vmem:[#allocation7 + $0x7e0] sm:$0xff]  ;;  %v1492_v33 = vld [vmem:[#allocation7 + $0x7c8] sm:$0xff] }
 0x2ca   : > { %2162 = vmatprep.subr.mxu1 %v1416_v37  ;;  %2092 = vmatpush1.msra.mxu0 %v1287_v38  ;;  %v1363_v3 = vld [vmem:[#allocation7 + $0x3c0] sm:$0xff]  ;;  %v1360_v58 = vld [vmem:[#allocation7 + $0x3a8] sm:$0xff] }
 0x2cb   : > { %2163 = vmatpush1.msra.mxu1 %v1415_v39  ;;  %2093 = vmatprep.subr.mxu0 %v1284_v40  ;;  %v1491_v34 = vld [vmem:[#allocation7 + $0x7c0] sm:$0xff]  ;;  %v1488_v17 = vld [vmem:[#allocation7 + $0x7a8] sm:$0xff] }
 0x2cc   : > { %2164 = vmatprep.subr.mxu1 %v1412_v41  ;;  %2094 = vmatpush1.msra.mxu0 %v1283_v42  ;;  %v1359_v35 = vld [vmem:[#allocation7 + $0x3a0] sm:$0xff]  ;;  %v1356_v37 = vld [vmem:[#allocation7 + $0x388] sm:$0xff] }
 0x2cd   : > { %2165 = vmatpush1.msra.mxu1 %v1411_v43  ;;  %2095 = vmatprep.subr.mxu0 %v1280_v44  ;;  %v1487_v36 = vld [vmem:[#allocation7 + $0x7a0] sm:$0xff]  ;;  %v1484_v38 = vld [vmem:[#allocation7 + $0x788] sm:$0xff] }
 0x2ce   : > { %2166 = vmatprep.subr.mxu1 %v1408_v45  ;;  %2096 = vmatpush1.msra.mxu0 %v1279_v46  ;;  %v1355_v39 = vld [vmem:[#allocation7 + $0x380] sm:$0xff]  ;;  %v1352_v41 = vld [vmem:[#allocation7 + $0x368] sm:$0xff] }
 0x2cf   : > { %2167 = vmatpush1.msra.mxu1 %v1407_v47  ;;  %2097 = vmatprep.subr.mxu0 %v1276_v48  ;;  %v1483_v40 = vld [vmem:[#allocation7 + $0x780] sm:$0xff]  ;;  %v1480_v42 = vld [vmem:[#allocation7 + $0x768] sm:$0xff] }
 0x2d0   : > { %2168 = vmatprep.subr.mxu1 %v1404_v49  ;;  %2098 = vmatpush1.msra.mxu0 %v1275_v50  ;;  %v1351_v43 = vld [vmem:[#allocation7 + $0x360] sm:$0xff]  ;;  %v1348_v45 = vld [vmem:[#allocation7 + $0x348] sm:$0xff] }
 0x2d1   : > { %2169 = vmatpush1.msra.mxu1 %v1403_v54  ;;  %2099 = vmatprep.subr.mxu0 %v1272_v55  ;;  %v1479_v44 = vld [vmem:[#allocation7 + $0x760] sm:$0xff]  ;;  %v1476_v46 = vld [vmem:[#allocation7 + $0x748] sm:$0xff] }
 0x2d2   : > { %2170 = vmatprep.subr.mxu1 %v1400_v57  ;;  %2100 = vmatpush1.msra.mxu0 %v1271_v59  ;;  %v1347_v47 = vld [vmem:[#allocation7 + $0x340] sm:$0xff]  ;;  %v1344_v49 = vld [vmem:[#allocation7 + $0x328] sm:$0xff] }
 0x2d3   : > { %2171 = vmatpush1.msra.mxu1 %v1399_v60  ;;  %2101 = vmatprep.subr.mxu0 %v1268_v61  ;;  %v1475_v48 = vld [vmem:[#allocation7 + $0x740] sm:$0xff]  ;;  %v1472_v50 = vld [vmem:[#allocation7 + $0x728] sm:$0xff] }
 0x2d4   : > { %2172 = vmatprep.subr.mxu1 %v1396_v62  ;;  %2102 = vmatpush1.msra.mxu0 %v1267_v63  ;;  %v1343_v54 = vld [vmem:[#allocation7 + $0x320] sm:$0xff]  ;;  %v1340_v57 = vld [vmem:[#allocation7 + $0x308] sm:$0xff] }
 0x2d5   : > { %2173 = vmatpush1.msra.mxu1 %v1395_v1  ;;  %2103 = vmatprep.subr.mxu0 %v1264_v2  ;;  %v1471_v55 = vld [vmem:[#allocation7 + $0x720] sm:$0xff]  ;;  %v1468_v59 = vld [vmem:[#allocation7 + $0x708] sm:$0xff] }
 0x2d6   : > { %2174 = vmatprep.subr.mxu1 %v1392_v4  ;;  %2104 = vmatpush1.msra.mxu0 %v1263_v5  ;;  %v1339_v60 = vld [vmem:[#allocation7 + $0x300] sm:$0xff]  ;;  %v1336_v62 = vld [vmem:[#allocation7 + $0x2e8] sm:$0xff] }
 0x2d7   : > { %2175 = vmatpush1.msra.mxu1 %v1391_v6  ;;  %2105 = vmatprep.subr.mxu0 %v1260_v7  ;;  %v1467_v61 = vld [vmem:[#allocation7 + $0x700] sm:$0xff]  ;;  %v1464_v63 = vld [vmem:[#allocation7 + $0x6e8] sm:$0xff] }
 0x2d8   : > { %2176 = vmatprep.subr.mxu1 %v1388_v9  ;;  %2106 = vmatpush1.msra.mxu0 %v1259_v10  ;;  %v1335_v1 = vld [vmem:[#allocation7 + $0x2e0] sm:$0xff]  ;;  %v1332_v4 = vld [vmem:[#allocation7 + $0x2c8] sm:$0xff] }
 0x2d9   : > { %2177 = vmatpush1.msra.mxu1 %v1387_v11  ;;  %2107 = vmatprep.subr.mxu0 %v1256_v12  ;;  %v1463_v2 = vld [vmem:[#allocation7 + $0x6e0] sm:$0xff]  ;;  %v1460_v5 = vld [vmem:[#allocation7 + $0x6c8] sm:$0xff] }
 0x2da   : > { %2178 = vmatprep.subr.mxu1 %v1384_v13  ;;  %2108 = vmatpush1.msra.mxu0 %v1255_v14  ;;  %v1331_v6 = vld [vmem:[#allocation7 + $0x2c0] sm:$0xff]  ;;  %v1328_v9 = vld [vmem:[#allocation7 + $0x2a8] sm:$0xff]  ;;  %v1242_v13 = vld [vmem:[#allocation3] sm:$0xff] }
 0x2db   : > { %2179 = vmatpush1.msra.mxu1 %v1383_v15  ;;  %2109 = vmatprep.subr.mxu0 %v1252_v16  ;;  %v1459_v7 = vld [vmem:[#allocation7 + $0x6c0] sm:$0xff]  ;;  %v1456_v10 = vld [vmem:[#allocation7 + $0x6a8] sm:$0xff] }
 0x2dc   : > { %2180 = vmatprep.subr.mxu1 %v1380_v18  ;;  %2110 = vmatpush1.msra.mxu0 %v1251_v19  ;;  %v1327_v11 = vld [vmem:[#allocation7 + $0x2a0] sm:$0xff]  ;;  %v1324_v14 = vld [vmem:[#allocation7 + $0x288] sm:$0xff] }
 0x2dd   : > { %2181 = vmatpush1.msra.mxu1 %v1379_v21  ;;  %2111 = vmatprep.subr.mxu0 %v1248_v22  ;;  %v1455_v12 = vld [vmem:[#allocation7 + $0x6a0] sm:$0xff]  ;;  %v1452_v15 = vld [vmem:[#allocation7 + $0x688] sm:$0xff]  ;;  %v2062_v22 = vcombine.high %v1242_v13, %v1242_v13 }
 0x2de   : > { %2182 = vmatprep.subr.mxu1 %v1376_v23  ;;  %2112 = vmatpush1.msra.mxu0 %v1247_v24  ;;  %v1323_v16 = vld [vmem:[#allocation7 + $0x280] sm:$0xff]  ;;  %v1320_v19 = vld [vmem:[#allocation7 + $0x268] sm:$0xff] }
 0x2df   : > { %2183 = vmatpush1.msra.mxu1 %v1375_v25  ;;  %2113 = vmatprep.subr.mxu0 %v1244_v26  ;;  %v1451_v18 = vld [vmem:[#allocation7 + $0x680] sm:$0xff]  ;;  %v1448_v21 = vld [vmem:[#allocation7 + $0x668] sm:$0xff] }
 0x2e0   : > { %2184 = vmatprep.subr.mxu1 %v1372_v8  ;;  %2114 = vmatpush1.msra.mxu0 %v1243_v27  ;;  %v1319_v23 = vld [vmem:[#allocation7 + $0x260] sm:$0xff]  ;;  %v1316_v25 = vld [vmem:[#allocation7 + $0x248] sm:$0xff]  ;;  %v3491_v8 = vrot.slane %v1242_v13, %v3433_v20  ;;  %v1273_v13 = vld [vmem:[#allocation7 + $0xf0] sm:$0xff] }
 0x2e1   : > { %2185 = vmatpush1.msra.mxu1 %v1371_v28  ;;  %2115 = vmatprep.subr.mxu0 %v1368_v29  ;;  %v1447_v24 = vld [vmem:[#allocation7 + $0x660] sm:$0xff]  ;;  %v1444_v26 = vld [vmem:[#allocation7 + $0x648] sm:$0xff] }
 0x2e2   : > { %2186 = vmatprep.subr.mxu1 %v1496_v30  ;;  %2116 = vmatpush2.msra.mxu0 %v1367_v31  ;;  %v1315_v27 = vld [vmem:[#allocation7 + $0x240] sm:$0xff]  ;;  %v1312_v29 = vld [vmem:[#allocation7 + $0x228] sm:$0xff]  ;;  %v3494_v31 = vrot.slane %v2062_v22, %v3433_v20  ;;  %v1394_v22 = vld [vmem:[#allocation7 + $0x4b8] sm:$0xff] }
 0x2e3   : > { %2187 = vmatpush2.msra.mxu1 %v1495_v0  ;;  %2117 = vmatprep.subr.mxu0 %v1364_v32  ;;  %v1443_v28 = vld [vmem:[#allocation7 + $0x640] sm:$0xff]  ;;  %v1440_v30 = vld [vmem:[#allocation7 + $0x628] sm:$0xff] }
 0x2e4   : > { %2188 = vmatprep.subr.mxu1 %v1492_v33  ;;  %2118 = vmatpush2.msra.mxu0 %v1363_v3  ;;  %v1311_v0 = vld [vmem:[#allocation7 + $0x220] sm:$0xff]  ;;  %v1308_v33 = vld [vmem:[#allocation7 + $0x208] sm:$0xff]  ;;  %v3502_v20 = vcombine.high %v3494_v31, %v3494_v31 }
 0x2e5   : > { %2189 = vmatpush2.msra.mxu1 %v1491_v34  ;;  %2119 = vmatprep.subr.mxu0 %v1360_v58  ;;  %v1439_v32 = vld [vmem:[#allocation7 + $0x620] sm:$0xff]  ;;  %v1436_v3 = vld [vmem:[#allocation7 + $0x608] sm:$0xff]  ;;  %v3498_v34 = vcombine.high %v3491_v8, %v3491_v8 }
 0x2e6   : > { %2190 = vmatprep.subr.mxu1 %v1488_v17  ;;  %2120 = vmatpush2.msra.mxu0 %v1359_v35  ;;  %v1307_v58 = vld [vmem:[#allocation7 + $0x200] sm:$0xff]  ;;  %v1306_v35 = vld [vmem:[#allocation7 + $0x1f8] sm:$0xff] }
 0x2e7   : > { %2191 = vmatpush2.msra.mxu1 %v1487_v36  ;;  %2121 = vmatprep.subr.mxu0 %v1356_v37  ;;  %v1435_v17 = vld [vmem:[#allocation7 + $0x600] sm:$0xff]  ;;  %v1434_v36 = vld [vmem:[#allocation7 + $0x5f8] sm:$0xff]  ;;  %v1305_v37 = vld [vmem:[#allocation7 + $0x1f0] sm:$0xff] }
 0x2e8   : > { %2192 = vmatprep.subr.mxu1 %v1484_v38  ;;  %2122 = vmatpush2.msra.mxu0 %v1355_v39  ;;  %v1433_v38 = vld [vmem:[#allocation7 + $0x5f0] sm:$0xff]  ;;  %v1302_v39 = vld [vmem:[#allocation7 + $0x1d8] sm:$0xff] }
 0x2e9   : > { %2193 = vmatpush2.msra.mxu1 %v1483_v40  ;;  %2123 = vmatprep.subr.mxu0 %v1352_v41  ;;  %v1430_v40 = vld [vmem:[#allocation7 + $0x5d8] sm:$0xff]  ;;  %v1301_v41 = vld [vmem:[#allocation7 + $0x1d0] sm:$0xff] }
 0x2ea   : > { %2194 = vmatprep.subr.mxu1 %v1480_v42  ;;  %2124 = vmatpush2.msra.mxu0 %v1351_v43  ;;  %v1429_v42 = vld [vmem:[#allocation7 + $0x5d0] sm:$0xff]  ;;  %v1298_v43 = vld [vmem:[#allocation7 + $0x1b8] sm:$0xff] }
 0x2eb   : > { %2195 = vmatpush2.msra.mxu1 %v1479_v44  ;;  %2125 = vmatprep.subr.mxu0 %v1348_v45  ;;  %v1426_v44 = vld [vmem:[#allocation7 + $0x5b8] sm:$0xff]  ;;  %v1297_v45 = vld [vmem:[#allocation7 + $0x1b0] sm:$0xff] }
 0x2ec   : > { %2196 = vmatprep.subr.mxu1 %v1476_v46  ;;  %2126 = vmatpush2.msra.mxu0 %v1347_v47  ;;  %v1425_v46 = vld [vmem:[#allocation7 + $0x5b0] sm:$0xff]  ;;  %v1294_v47 = vld [vmem:[#allocation7 + $0x198] sm:$0xff] }
 0x2ed   : > { %2197 = vmatpush2.msra.mxu1 %v1475_v48  ;;  %2127 = vmatprep.subr.mxu0 %v1344_v49  ;;  %v1422_v48 = vld [vmem:[#allocation7 + $0x598] sm:$0xff]  ;;  %v1293_v49 = vld [vmem:[#allocation7 + $0x190] sm:$0xff] }
 0x2ee   : > { %2198 = vmatprep.subr.mxu1 %v1472_v50  ;;  %2128 = vmatpush2.msra.mxu0 %v1343_v54  ;;  %v1421_v50 = vld [vmem:[#allocation7 + $0x590] sm:$0xff]  ;;  %v1290_v54 = vld [vmem:[#allocation7 + $0x178] sm:$0xff] }
 0x2ef   : > { %2199 = vmatpush2.msra.mxu1 %v1471_v55  ;;  %2129 = vmatprep.subr.mxu0 %v1340_v57  ;;  %v1418_v55 = vld [vmem:[#allocation7 + $0x578] sm:$0xff]  ;;  %v1289_v57 = vld [vmem:[#allocation7 + $0x170] sm:$0xff] }
 0x2f0   : > { %2200 = vmatprep.subr.mxu1 %v1468_v59  ;;  %2130 = vmatpush2.msra.mxu0 %v1339_v60  ;;  %v1417_v59 = vld [vmem:[#allocation7 + $0x570] sm:$0xff]  ;;  %v1286_v60 = vld [vmem:[#allocation7 + $0x158] sm:$0xff] }
 0x2f1   : > { %2201 = vmatpush2.msra.mxu1 %v1467_v61  ;;  %2131 = vmatprep.subr.mxu0 %v1336_v62  ;;  %v1414_v61 = vld [vmem:[#allocation7 + $0x558] sm:$0xff]  ;;  %v1285_v62 = vld [vmem:[#allocation7 + $0x150] sm:$0xff] }
 0x2f2   : > { %2202 = vmatprep.subr.mxu1 %v1464_v63  ;;  %2132 = vmatpush2.msra.mxu0 %v1335_v1  ;;  %v1413_v63 = vld [vmem:[#allocation7 + $0x550] sm:$0xff]  ;;  %v1282_v1 = vld [vmem:[#allocation7 + $0x138] sm:$0xff] }
 0x2f3   : > { %2203 = vmatpush2.msra.mxu1 %v1463_v2  ;;  %2133 = vmatprep.subr.mxu0 %v1332_v4  ;;  %v1410_v2 = vld [vmem:[#allocation7 + $0x538] sm:$0xff]  ;;  %v1281_v4 = vld [vmem:[#allocation7 + $0x130] sm:$0xff] }
 0x2f4   : > { %2204 = vmatprep.subr.mxu1 %v1460_v5  ;;  %2134 = vmatpush2.msra.mxu0 %v1331_v6  ;;  %v1409_v5 = vld [vmem:[#allocation7 + $0x530] sm:$0xff]  ;;  %v1278_v6 = vld [vmem:[#allocation7 + $0x118] sm:$0xff] }
 0x2f5   : > { %2205 = vmatpush2.msra.mxu1 %v1459_v7  ;;  %2135 = vmatprep.subr.mxu0 %v1328_v9  ;;  %v1406_v7 = vld [vmem:[#allocation7 + $0x518] sm:$0xff]  ;;  %v1277_v9 = vld [vmem:[#allocation7 + $0x110] sm:$0xff] }
 0x2f6   : > { %2206 = vmatprep.subr.mxu1 %v1456_v10  ;;  %2136 = vmatpush2.msra.mxu0 %v1327_v11  ;;  %v1405_v10 = vld [vmem:[#allocation7 + $0x510] sm:$0xff]  ;;  %v1274_v11 = vld [vmem:[#allocation7 + $0xf8] sm:$0xff] }
 0x2f7   : > { %2207 = vmatpush2.msra.mxu1 %v1455_v12  ;;  %2137 = vmatprep.subr.mxu0 %v1324_v14  ;;  %v1402_v12 = vld [vmem:[#allocation7 + $0x4f8] sm:$0xff]  ;;  %v1401_v14 = vld [vmem:[#allocation7 + $0x4f0] sm:$0xff] }
 0x2f8   : > { %2208 = vmatprep.subr.mxu1 %v1452_v15  ;;  %2138 = vmatpush2.msra.mxu0 %v1323_v16  ;;  %v1270_v15 = vld [vmem:[#allocation7 + $0xd8] sm:$0xff] }
 0x2f9   : > { %2209 = vmatpush2.msra.mxu1 %v1451_v18  ;;  %2139 = vmatprep.subr.mxu0 %v1320_v19  ;;  %v1398_v16 = vld [vmem:[#allocation7 + $0x4d8] sm:$0xff]  ;;  %v1269_v18 = vld [vmem:[#allocation7 + $0xd0] sm:$0xff] }
 0x2fa   : > { %2210 = vmatprep.subr.mxu1 %v1448_v21  ;;  %2140 = vmatpush2.msra.mxu0 %v1319_v23  ;;  %v1397_v19 = vld [vmem:[#allocation7 + $0x4d0] sm:$0xff]  ;;  %v1266_v21 = vld [vmem:[#allocation7 + $0xb8] sm:$0xff] }
 0x2fb   : > { %2211 = vmatpush2.msra.mxu1 %v1447_v24  ;;  %2141 = vmatprep.subr.mxu0 %v1316_v25  ;;  %v1265_v23 = vld [vmem:[#allocation7 + $0xb0] sm:$0xff]  ;;  %v1262_v25 = vld [vmem:[#allocation7 + $0x98] sm:$0xff] }
 0x2fc   : > { %2212 = vmatprep.subr.mxu1 %v1444_v26  ;;  %2142 = vmatpush2.msra.mxu0 %v1315_v27  ;;  %v1393_v24 = vld [vmem:[#allocation7 + $0x4b0] sm:$0xff]  ;;  %v1390_v26 = vld [vmem:[#allocation7 + $0x498] sm:$0xff] }
 0x2fd   : > { %2213 = vmatpush2.msra.mxu1 %v1443_v28  ;;  %2143 = vmatprep.subr.mxu0 %v1312_v29  ;;  %v1261_v27 = vld [vmem:[#allocation7 + $0x90] sm:$0xff]  ;;  %v1258_v29 = vld [vmem:[#allocation7 + $0x78] sm:$0xff] }
 0x2fe   : > { %2214 = vmatprep.subr.mxu1 %v1440_v30  ;;  %2144 = vmatpush2.msra.mxu0 %v1311_v0  ;;  %v1389_v28 = vld [vmem:[#allocation7 + $0x490] sm:$0xff]  ;;  %v1386_v30 = vld [vmem:[#allocation7 + $0x478] sm:$0xff] }
 0x2ff   : > { %2215 = vmatpush2.msra.mxu1 %v1439_v32  ;;  %2145 = vmatprep.subr.mxu0 %v1308_v33  ;;  %v1257_v0 = vld [vmem:[#allocation7 + $0x70] sm:$0xff]  ;;  %v1254_v33 = vld [vmem:[#allocation7 + $0x58] sm:$0xff] }
 0x300   : > { %2216 = vmatprep.subr.mxu1 %v1436_v3  ;;  %2146 = vmatpush2.msra.mxu0 %v1307_v58  ;;  %v1385_v32 = vld [vmem:[#allocation7 + $0x470] sm:$0xff]  ;;  %v1382_v3 = vld [vmem:[#allocation7 + $0x458] sm:$0xff] }
 0x301   : > { %2147 = vmatprep.mubr.f32.mxu0 %v3498_v34  ;;  %2217 = vmatpush2.msra.mxu1 %v1435_v17  ;;  %v1253_v58 = vld [vmem:[#allocation7 + $0x50] sm:$0xff] }
 0x302   : > { %2148 = vmatmul.mubr.f32.vlgmr.msra.gmra.mxu0 %v3491_v8  ;;  %2218 = vmatprep.mubr.f32.mxu1 %v3502_v20  ;;  %v1381_v17 = vld [vmem:[#allocation7 + $0x450] sm:$0xff] }
 0x303   : > { %2225 = vmatprep.subr.mxu0 %v1306_v35  ;;  %2296 = vmatprep.subr.mxu1 %v1434_v36  ;;  %v1250_v35 = vld [vmem:[#allocation7 + $0x38] sm:$0xff] }
 0x304   : > { %2219 = vmatmul.mubr.f32.vlgmr.msra.gmra.mxu1 %v3494_v31  ;;  %2226 = vmatpush1.msra.mxu0 %v1305_v37  ;;  %v1378_v36 = vld [vmem:[#allocation7 + $0x438] sm:$0xff]  ;;  %v1249_v37 = vld [vmem:[#allocation7 + $0x30] sm:$0xff] }
 0x305   : > { %2297 = vmatpush1.msra.mxu1 %v1433_v38  ;;  %2227 = vmatprep.subr.mxu0 %v1302_v39  ;;  %v1377_v38 = vld [vmem:[#allocation7 + $0x430] sm:$0xff]  ;;  %v1246_v39 = vld [vmem:[#allocation7 + $0x18] sm:$0xff] }
 0x306   : > { %2298 = vmatprep.subr.mxu1 %v1430_v40  ;;  %2228 = vmatpush1.msra.mxu0 %v1301_v41  ;;  %v1374_v40 = vld [vmem:[#allocation7 + $0x418] sm:$0xff]  ;;  %v1245_v41 = vld [vmem:[#allocation7 + $0x10] sm:$0xff] }
 0x307   : > { %2299 = vmatpush1.msra.mxu1 %v1429_v42  ;;  %2229 = vmatprep.subr.mxu0 %v1298_v43  ;;  %v1373_v42 = vld [vmem:[#allocation7 + $0x410] sm:$0xff]  ;;  %v1370_v43 = vld [vmem:[#allocation7 + $0x3f8] sm:$0xff] }
 0x308   : > { %2300 = vmatprep.subr.mxu1 %v1426_v44  ;;  %2230 = vmatpush1.msra.mxu0 %v1297_v45  ;;  %v1498_v44 = vld [vmem:[#allocation7 + $0x7f8] sm:$0xff]  ;;  %v1369_v45 = vld [vmem:[#allocation7 + $0x3f0] sm:$0xff] }
 0x309   : > { %2301 = vmatpush1.msra.mxu1 %v1425_v46  ;;  %2231 = vmatprep.subr.mxu0 %v1294_v47  ;;  %v1497_v46 = vld [vmem:[#allocation7 + $0x7f0] sm:$0xff]  ;;  %v1366_v47 = vld [vmem:[#allocation7 + $0x3d8] sm:$0xff] }
 0x30a   : > { %2302 = vmatprep.subr.mxu1 %v1422_v48  ;;  %2232 = vmatpush1.msra.mxu0 %v1293_v49  ;;  %v1494_v48 = vld [vmem:[#allocation7 + $0x7d8] sm:$0xff]  ;;  %v1365_v49 = vld [vmem:[#allocation7 + $0x3d0] sm:$0xff] }
 0x30b   : > { %2303 = vmatpush1.msra.mxu1 %v1421_v50  ;;  %2233 = vmatprep.subr.mxu0 %v1290_v54  ;;  %v1493_v50 = vld [vmem:[#allocation7 + $0x7d0] sm:$0xff]  ;;  %v1362_v54 = vld [vmem:[#allocation7 + $0x3b8] sm:$0xff] }
 0x30c   : > { %2304 = vmatprep.subr.mxu1 %v1418_v55  ;;  %2234 = vmatpush1.msra.mxu0 %v1289_v57  ;;  %v1490_v55 = vld [vmem:[#allocation7 + $0x7b8] sm:$0xff]  ;;  %v1361_v57 = vld [vmem:[#allocation7 + $0x3b0] sm:$0xff] }
 0x30d   : > { %2305 = vmatpush1.msra.mxu1 %v1417_v59  ;;  %2235 = vmatprep.subr.mxu0 %v1286_v60  ;;  %v1489_v59 = vld [vmem:[#allocation7 + $0x7b0] sm:$0xff]  ;;  %v1358_v60 = vld [vmem:[#allocation7 + $0x398] sm:$0xff] }
 0x30e   : > { %2306 = vmatprep.subr.mxu1 %v1414_v61  ;;  %2236 = vmatpush1.msra.mxu0 %v1285_v62  ;;  %v1486_v61 = vld [vmem:[#allocation7 + $0x798] sm:$0xff]  ;;  %v1357_v62 = vld [vmem:[#allocation7 + $0x390] sm:$0xff] }
 0x30f   : > { %2307 = vmatpush1.msra.mxu1 %v1413_v63  ;;  %2237 = vmatprep.subr.mxu0 %v1282_v1  ;;  %v1485_v63 = vld [vmem:[#allocation7 + $0x790] sm:$0xff]  ;;  %v1354_v1 = vld [vmem:[#allocation7 + $0x378] sm:$0xff] }
 0x310   : > { %2308 = vmatprep.subr.mxu1 %v1410_v2  ;;  %2238 = vmatpush1.msra.mxu0 %v1281_v4  ;;  %v1482_v2 = vld [vmem:[#allocation7 + $0x778] sm:$0xff]  ;;  %v1353_v4 = vld [vmem:[#allocation7 + $0x370] sm:$0xff] }
 0x311   : > { %2309 = vmatpush1.msra.mxu1 %v1409_v5  ;;  %2239 = vmatprep.subr.mxu0 %v1278_v6  ;;  %v1481_v5 = vld [vmem:[#allocation7 + $0x770] sm:$0xff]  ;;  %v1350_v6 = vld [vmem:[#allocation7 + $0x358] sm:$0xff] }
 0x312   : > { %2310 = vmatprep.subr.mxu1 %v1406_v7  ;;  %2240 = vmatpush1.msra.mxu0 %v1277_v9  ;;  %v1478_v7 = vld [vmem:[#allocation7 + $0x758] sm:$0xff]  ;;  %v1349_v9 = vld [vmem:[#allocation7 + $0x350] sm:$0xff] }
 0x313   : > { %2311 = vmatpush1.msra.mxu1 %v1405_v10  ;;  %2241 = vmatprep.subr.mxu0 %v1274_v11  ;;  %v1477_v10 = vld [vmem:[#allocation7 + $0x750] sm:$0xff]  ;;  %v1346_v11 = vld [vmem:[#allocation7 + $0x338] sm:$0xff] }
 0x314   : > { %2312 = vmatprep.subr.mxu1 %v1402_v12  ;;  %2242 = vmatpush1.msra.mxu0 %v1273_v13  ;;  %v1474_v12 = vld [vmem:[#allocation7 + $0x738] sm:$0xff]  ;;  %v1345_v13 = vld [vmem:[#allocation7 + $0x330] sm:$0xff] }
 0x315   : > { %2313 = vmatpush1.msra.mxu1 %v1401_v14  ;;  %2243 = vmatprep.subr.mxu0 %v1270_v15  ;;  %v1473_v14 = vld [vmem:[#allocation7 + $0x730] sm:$0xff]  ;;  %v1342_v15 = vld [vmem:[#allocation7 + $0x318] sm:$0xff] }
 0x316   : > { %2314 = vmatprep.subr.mxu1 %v1398_v16  ;;  %2244 = vmatpush1.msra.mxu0 %v1269_v18  ;;  %v1470_v16 = vld [vmem:[#allocation7 + $0x718] sm:$0xff]  ;;  %v1341_v18 = vld [vmem:[#allocation7 + $0x310] sm:$0xff] }
 0x317   : > { %2315 = vmatpush1.msra.mxu1 %v1397_v19  ;;  %2245 = vmatprep.subr.mxu0 %v1266_v21  ;;  %v1469_v19 = vld [vmem:[#allocation7 + $0x710] sm:$0xff]  ;;  %v1338_v21 = vld [vmem:[#allocation7 + $0x2f8] sm:$0xff] }
 0x318   : > { %2316 = vmatprep.subr.mxu1 %v1394_v22  ;;  %2246 = vmatpush1.msra.mxu0 %v1265_v23  ;;  %v1466_v22 = vld [vmem:[#allocation7 + $0x6f8] sm:$0xff]  ;;  %v1337_v23 = vld [vmem:[#allocation7 + $0x2f0] sm:$0xff] }
 0x319   : > { %2317 = vmatpush1.msra.mxu1 %v1393_v24  ;;  %2247 = vmatprep.subr.mxu0 %v1262_v25  ;;  %v1465_v24 = vld [vmem:[#allocation7 + $0x6f0] sm:$0xff]  ;;  %v1334_v25 = vld [vmem:[#allocation7 + $0x2d8] sm:$0xff] }
 0x31a   : > { %2318 = vmatprep.subr.mxu1 %v1390_v26  ;;  %2248 = vmatpush1.msra.mxu0 %v1261_v27  ;;  %v1462_v26 = vld [vmem:[#allocation7 + $0x6d8] sm:$0xff]  ;;  %v1333_v27 = vld [vmem:[#allocation7 + $0x2d0] sm:$0xff] }
 0x31b   : > { %2319 = vmatpush1.msra.mxu1 %v1389_v28  ;;  %2249 = vmatprep.subr.mxu0 %v1258_v29  ;;  %v1461_v28 = vld [vmem:[#allocation7 + $0x6d0] sm:$0xff]  ;;  %v1330_v29 = vld [vmem:[#allocation7 + $0x2b8] sm:$0xff] }
 0x31c   : > { %2320 = vmatprep.subr.mxu1 %v1386_v30  ;;  %2250 = vmatpush1.msra.mxu0 %v1257_v0  ;;  %v1458_v30 = vld [vmem:[#allocation7 + $0x6b8] sm:$0xff]  ;;  %v1329_v0 = vld [vmem:[#allocation7 + $0x2b0] sm:$0xff] }
 0x31d   : > { %2321 = vmatpush1.msra.mxu1 %v1385_v32  ;;  %2251 = vmatprep.subr.mxu0 %v1254_v33  ;;  %v1457_v32 = vld [vmem:[#allocation7 + $0x6b0] sm:$0xff]  ;;  %v1326_v33 = vld [vmem:[#allocation7 + $0x298] sm:$0xff] }
 0x31e   : > { %2322 = vmatprep.subr.mxu1 %v1382_v3  ;;  %2252 = vmatpush1.msra.mxu0 %v1253_v58  ;;  %v1454_v3 = vld [vmem:[#allocation7 + $0x698] sm:$0xff]  ;;  %v1325_v58 = vld [vmem:[#allocation7 + $0x290] sm:$0xff] }
 0x31f   : > { %2323 = vmatpush1.msra.mxu1 %v1381_v17  ;;  %2253 = vmatprep.subr.mxu0 %v1250_v35  ;;  %v1453_v17 = vld [vmem:[#allocation7 + $0x690] sm:$0xff]  ;;  %v1322_v35 = vld [vmem:[#allocation7 + $0x278] sm:$0xff] }
 0x320   : > { %2324 = vmatprep.subr.mxu1 %v1378_v36  ;;  %2254 = vmatpush1.msra.mxu0 %v1249_v37  ;;  %v1450_v36 = vld [vmem:[#allocation7 + $0x678] sm:$0xff]  ;;  %v1321_v37 = vld [vmem:[#allocation7 + $0x270] sm:$0xff] }
 0x321   : > { %2325 = vmatpush1.msra.mxu1 %v1377_v38  ;;  %2255 = vmatprep.subr.mxu0 %v1246_v39  ;;  %v1449_v38 = vld [vmem:[#allocation7 + $0x670] sm:$0xff]  ;;  %v1318_v39 = vld [vmem:[#allocation7 + $0x258] sm:$0xff] }
 0x322   : > { %2326 = vmatprep.subr.mxu1 %v1374_v40  ;;  %2256 = vmatpush1.msra.mxu0 %v1245_v41  ;;  %v1446_v40 = vld [vmem:[#allocation7 + $0x658] sm:$0xff]  ;;  %v1317_v41 = vld [vmem:[#allocation7 + $0x250] sm:$0xff] }
 0x323   : > { %2327 = vmatpush1.msra.mxu1 %v1373_v42  ;;  %2257 = vmatprep.subr.mxu0 %v1370_v43  ;;  %v1445_v42 = vld [vmem:[#allocation7 + $0x650] sm:$0xff]  ;;  %v1314_v43 = vld [vmem:[#allocation7 + $0x238] sm:$0xff] }
 0x324   : > { %2328 = vmatprep.subr.mxu1 %v1498_v44  ;;  %2258 = vmatpush2.msra.mxu0 %v1369_v45  ;;  %v1442_v44 = vld [vmem:[#allocation7 + $0x638] sm:$0xff]  ;;  %v1313_v45 = vld [vmem:[#allocation7 + $0x230] sm:$0xff] }
 0x325   : > { %2329 = vmatpush2.msra.mxu1 %v1497_v46  ;;  %2259 = vmatprep.subr.mxu0 %v1366_v47  ;;  %v1441_v46 = vld [vmem:[#allocation7 + $0x630] sm:$0xff]  ;;  %v1310_v47 = vld [vmem:[#allocation7 + $0x218] sm:$0xff] }
 0x326   : > { %2330 = vmatprep.subr.mxu1 %v1494_v48  ;;  %2260 = vmatpush2.msra.mxu0 %v1365_v49  ;;  %v1438_v48 = vld [vmem:[#allocation7 + $0x618] sm:$0xff]  ;;  %v1309_v49 = vld [vmem:[#allocation7 + $0x210] sm:$0xff] }
 0x327   : > { %2331 = vmatpush2.msra.mxu1 %v1493_v50  ;;  %2261 = vmatprep.subr.mxu0 %v1362_v54  ;;  %v1437_v50 = vld [vmem:[#allocation7 + $0x610] sm:$0xff]  ;;  %v2428_v54 = vld [vmem:[%s3749_s10 + $0xf8] sm:$0xff] }
 0x328   : > { %2332 = vmatprep.subr.mxu1 %v1490_v55  ;;  %2262 = vmatpush2.msra.mxu0 %v1361_v57  ;;  %v2412_v55 = vld [vmem:[%s3749_s10 + $0x78] sm:$0xff]  ;;  %v2427_v57 = vld [vmem:[%s3749_s10 + $0xf0] sm:$0xff] }
 0x329   : > { %2333 = vmatpush2.msra.mxu1 %v1489_v59  ;;  %2263 = vmatprep.subr.mxu0 %v1358_v60  ;;  %v2409_v59 = vld [vmem:[%s3749_s10 + $0x60] sm:$0xff]  ;;  %v2424_v60 = vld [vmem:[%s3749_s10 + $0xd8] sm:$0xff] }
 0x32a   : > { %2334 = vmatprep.subr.mxu1 %v1486_v61  ;;  %2264 = vmatpush2.msra.mxu0 %v1357_v62  ;;  %v2408_v61 = vld [vmem:[%s3749_s10 + $0x58] sm:$0xff]  ;;  %v2423_v62 = vld [vmem:[%s3749_s10 + $0xd0] sm:$0xff] }
 0x32b   : > { %2335 = vmatpush2.msra.mxu1 %v1485_v63  ;;  %2265 = vmatprep.subr.mxu0 %v1354_v1  ;;  %v2407_v63 = vld [vmem:[%s3749_s10 + $0x50] sm:$0xff]  ;;  %v2460_v1 = vld [vmem:[%s3749_s10 + $0x1f8] sm:$0xff] }
 0x32c   : > { %2336 = vmatprep.subr.mxu1 %v1482_v2  ;;  %2266 = vmatpush2.msra.mxu0 %v1353_v4  ;;  %v2444_v2 = vld [vmem:[%s3749_s10 + $0x178] sm:$0xff]  ;;  %v2459_v4 = vld [vmem:[%s3749_s10 + $0x1f0] sm:$0xff] }
 0x32d   : > { %2337 = vmatpush2.msra.mxu1 %v1481_v5  ;;  %2267 = vmatprep.subr.mxu0 %v1350_v6  ;;  %v2422_v5 = vld [vmem:[%s3749_s10 + $0xc8] sm:$0xff]  ;;  %v2443_v6 = vld [vmem:[%s3749_s10 + $0x170] sm:$0xff] }
 0x32e   : > { %2338 = vmatprep.subr.mxu1 %v1478_v7  ;;  %2268 = vmatpush2.msra.mxu0 %v1349_v9  ;;  %v2406_v7 = vld [vmem:[%s3749_s10 + $0x48] sm:$0xff] }
 0x32f   : > { %2339 = vmatpush2.msra.mxu1 %v1477_v10  ;;  %2269 = vmatprep.subr.mxu0 %v1346_v11  ;;  %v2458_v9 = vld [vmem:[%s3749_s10 + $0x1e8] sm:$0xff]  ;;  %v2421_v10 = vld [vmem:[%s3749_s10 + $0xc0] sm:$0xff] }
 0x330   : > { %2340 = vmatprep.subr.mxu1 %v1474_v12  ;;  %2270 = vmatpush2.msra.mxu0 %v1345_v13  ;;  %v2442_v11 = vld [vmem:[%s3749_s10 + $0x168] sm:$0xff]  ;;  %v2405_v12 = vld [vmem:[%s3749_s10 + $0x40] sm:$0xff] }
 0x331   : > { %2341 = vmatpush2.msra.mxu1 %v1473_v14  ;;  %2271 = vmatprep.subr.mxu0 %v1342_v15  ;;  %v2457_v13 = vld [vmem:[%s3749_s10 + $0x1e0] sm:$0xff]  ;;  %v2420_v14 = vld [vmem:[%s3749_s10 + $0xb8] sm:$0xff] }
 0x332   : > { %2342 = vmatprep.subr.mxu1 %v1470_v16  ;;  %2272 = vmatpush2.msra.mxu0 %v1341_v18  ;;  %v2441_v15 = vld [vmem:[%s3749_s10 + $0x160] sm:$0xff]  ;;  %v2404_v16 = vld [vmem:[%s3749_s10 + $0x38] sm:$0xff] }
 0x333   : > { %2343 = vmatpush2.msra.mxu1 %v1469_v19  ;;  %2273 = vmatprep.subr.mxu0 %v1338_v21  ;;  %v2456_v18 = vld [vmem:[%s3749_s10 + $0x1d8] sm:$0xff]  ;;  %v2419_v19 = vld [vmem:[%s3749_s10 + $0xb0] sm:$0xff] }
 0x334   : > { %2344 = vmatprep.subr.mxu1 %v1466_v22  ;;  %2274 = vmatpush2.msra.mxu0 %v1337_v23  ;;  %v2440_v21 = vld [vmem:[%s3749_s10 + $0x158] sm:$0xff]  ;;  %v2403_v22 = vld [vmem:[%s3749_s10 + $0x30] sm:$0xff] }
 0x335   : > { %2345 = vmatpush2.msra.mxu1 %v1465_v24  ;;  %2275 = vmatprep.subr.mxu0 %v1334_v25  ;;  %v2455_v23 = vld [vmem:[%s3749_s10 + $0x1d0] sm:$0xff]  ;;  %v2418_v24 = vld [vmem:[%s3749_s10 + $0xa8] sm:$0xff] }
 0x336   : > { %2346 = vmatprep.subr.mxu1 %v1462_v26  ;;  %2276 = vmatpush2.msra.mxu0 %v1333_v27  ;;  %v2439_v25 = vld [vmem:[%s3749_s10 + $0x150] sm:$0xff]  ;;  %v2402_v26 = vld [vmem:[%s3749_s10 + $0x28] sm:$0xff] }
 0x337   : > { %2347 = vmatpush2.msra.mxu1 %v1461_v28  ;;  %2277 = vmatprep.subr.mxu0 %v1330_v29  ;;  %v2454_v27 = vld [vmem:[%s3749_s10 + $0x1c8] sm:$0xff]  ;;  %v2417_v28 = vld [vmem:[%s3749_s10 + $0xa0] sm:$0xff] }
 0x338   : > { %2348 = vmatprep.subr.mxu1 %v1458_v30  ;;  %2278 = vmatpush2.msra.mxu0 %v1329_v0  ;;  %v2438_v29 = vld [vmem:[%s3749_s10 + $0x148] sm:$0xff]  ;;  %v2401_v30 = vld [vmem:[%s3749_s10 + $0x20] sm:$0xff] }
 0x339   : > { %2349 = vmatpush2.msra.mxu1 %v1457_v32  ;;  %2279 = vmatprep.subr.mxu0 %v1326_v33  ;;  %v2453_v0 = vld [vmem:[%s3749_s10 + $0x1c0] sm:$0xff]  ;;  %v2416_v32 = vld [vmem:[%s3749_s10 + $0x98] sm:$0xff] }
 0x33a   : > { %2350 = vmatprep.subr.mxu1 %v1454_v3  ;;  %2280 = vmatpush2.msra.mxu0 %v1325_v58  ;;  %v2437_v33 = vld [vmem:[%s3749_s10 + $0x140] sm:$0xff]  ;;  %v2400_v3 = vld [vmem:[%s3749_s10 + $0x18] sm:$0xff] }
 0x33b   : > { %2351 = vmatpush2.msra.mxu1 %v1453_v17  ;;  %2281 = vmatprep.subr.mxu0 %v1322_v35  ;;  %v2452_v58 = vld [vmem:[%s3749_s10 + $0x1b8] sm:$0xff]  ;;  %v2415_v17 = vld [vmem:[%s3749_s10 + $0x90] sm:$0xff] }
 0x33c   : > { %2352 = vmatprep.subr.mxu1 %v1450_v36  ;;  %2282 = vmatpush2.msra.mxu0 %v1321_v37  ;;  %v2436_v35 = vld [vmem:[%s3749_s10 + $0x138] sm:$0xff]  ;;  %v2399_v36 = vld [vmem:[%s3749_s10 + $0x10] sm:$0xff] }
 0x33d   : > { %2353 = vmatpush2.msra.mxu1 %v1449_v38  ;;  %2283 = vmatprep.subr.mxu0 %v1318_v39  ;;  %v2451_v37 = vld [vmem:[%s3749_s10 + $0x1b0] sm:$0xff]  ;;  %v2414_v38 = vld [vmem:[%s3749_s10 + $0x88] sm:$0xff] }
 0x33e   : > { %2354 = vmatprep.subr.mxu1 %v1446_v40  ;;  %2284 = vmatpush2.msra.mxu0 %v1317_v41  ;;  %v2435_v39 = vld [vmem:[%s3749_s10 + $0x130] sm:$0xff]  ;;  %v2398_v40 = vld [vmem:[%s3749_s10 + $0x8] sm:$0xff]  ;;  %v2413_v41 = vld [vmem:[%s3749_s10 + $0x80] sm:$0xff] }
 0x33f   : > { %2355 = vmatpush2.msra.mxu1 %v1445_v42  ;;  %2285 = vmatprep.subr.mxu0 %v1314_v43  ;;  %v2397_v42 = vld [vmem:[%s3749_s10] sm:$0xff]  ;;  %v1843_v43 = vpop.f32.mrf.mxu0 }
 0x340   : > { %2356 = vmatprep.subr.mxu1 %v1442_v44  ;;  %2286 = vmatpush2.msra.mxu0 %v1313_v45  ;;  %v1914_v44 = vpop.f32.mrf.mxu1 }
 0x341   : > { %2357 = vmatpush2.msra.mxu1 %v1441_v46  ;;  %2287 = vmatprep.subr.mxu0 %v1310_v47  ;;  %v1845_v45 = vpop.f32.mrf.mxu0 }
 0x342   : > { %2358 = vmatprep.subr.mxu1 %v1438_v48  ;;  %2288 = vmatpush2.msra.mxu0 %v1309_v49  ;;  %v1916_v46 = vpop.f32.mrf.mxu1 }
 0x343   : > { %2289 = vmatprep.mubr.f32.mxu0 %v3498_v34  ;;  %2359 = vmatpush2.msra.mxu1 %v1437_v50  ;;  %v2411_v34 = vld [vmem:[%s3749_s10 + $0x70] sm:$0xff] }
 0x344   : > { %2360 = vmatprep.mubr.f32.mxu1 %v3502_v20  ;;  %2290 = vmatmul.mubr.f32.vlgmr.msra.gmra.mxu0 %v3491_v8  ;;  %v2426_v20 = vld [vmem:[%s3749_s10 + $0xe8] sm:$0xff] }
 0x345   : > { %2361 = vmatmul.mubr.f32.vlgmr.msra.gmra.mxu1 %v3494_v31  ;;  %2729 = vmatprep.subr.mxu0 %v2428_v54  ;;  %v2410_v8 = vld [vmem:[%s3749_s10 + $0x68] sm:$0xff]  ;;  %v2425_v31 = vld [vmem:[%s3749_s10 + $0xe0] sm:$0xff] }
 0x346   : > { %2730 = vmatpush3.msra.mxu0 %v2412_v55  ;;  %2764 = vmatprep.subr.mxu1 %v2460_v1  ;;  %v2445_v1 = vld [vmem:[%s3749_s10 + $0x180] sm:$0xff] }
 0x347   : > { %2731 = vmatprep.subr.mxu0 %v2427_v57  ;;  %2765 = vmatpush3.msra.mxu1 %v2444_v2  ;;  %v2450_v57 = vld [vmem:[%s3749_s10 + $0x1a8] sm:$0xff]  ;;  %v2429_v2 = vld [vmem:[%s3749_s10 + $0x100] sm:$0xff] }
 0x348   : > { %2732 = vmatpush3.msra.mxu0 %v2411_v34  ;;  %2766 = vmatprep.subr.mxu1 %v2459_v4  ;;  %v2434_v34 = vld [vmem:[%s3749_s10 + $0x128] sm:$0xff]  ;;  %v1915_v4 = vadd.f32 %v1914_v44, %v1843_v43 }
 0x349   : > { %2733 = vmatprep.subr.mxu0 %v2426_v20  ;;  %2767 = vmatpush3.msra.mxu1 %v2443_v6  ;;  %v2449_v20 = vld [vmem:[%s3749_s10 + $0x1a0] sm:$0xff] }
 0x34a   : > { %2734 = vmatpush3.msra.mxu0 %v2410_v8  ;;  %2768 = vmatprep.subr.mxu1 %v2458_v9  ;;  %v2433_v8 = vld [vmem:[%s3749_s10 + $0x120] sm:$0xff] }
 0x34b   : > { %2735 = vmatprep.subr.mxu0 %v2425_v31  ;;  %2769 = vmatpush3.msra.mxu1 %v2442_v11  ;;  %v2448_v31 = vld [vmem:[%s3749_s10 + $0x198] sm:$0xff] }
 0x34c   : > { %2736 = vmatpush3.msra.mxu0 %v2409_v59  ;;  %2770 = vmatprep.subr.mxu1 %v2457_v13  ;;  %v2432_v59 = vld [vmem:[%s3749_s10 + $0x118] sm:$0xff] }
 0x34d   : > { %2737 = vmatprep.subr.mxu0 %v2424_v60  ;;  %2771 = vmatpush3.msra.mxu1 %v2441_v15  ;;  %v2447_v60 = vld [vmem:[%s3749_s10 + $0x190] sm:$0xff] }
 0x34e   : > { %2738 = vmatpush3.msra.mxu0 %v2408_v61  ;;  %2772 = vmatprep.subr.mxu1 %v2456_v18  ;;  %v2431_v61 = vld [vmem:[%s3749_s10 + $0x110] sm:$0xff] }
 0x34f   : > { %2739 = vmatprep.subr.mxu0 %v2423_v62  ;;  %2773 = vmatpush3.msra.mxu1 %v2440_v21  ;;  %v2446_v62 = vld [vmem:[%s3749_s10 + $0x188] sm:$0xff] }
 0x350   : > { %2740 = vmatpush3.msra.mxu0 %v2407_v63  ;;  %2774 = vmatprep.subr.mxu1 %v2455_v23  ;;  %v2430_v63 = vld [vmem:[%s3749_s10 + $0x108] sm:$0xff] }
 0x351   : > { %2741 = vmatprep.subr.mxu0 %v2422_v5  ;;  %2775 = vmatpush3.msra.mxu1 %v2439_v25  ;;  %v2367_v5 = vld [vmem:[%s3748_s9] sm:$0xf] }
 0x352   : > { %2742 = vmatpush3.msra.mxu0 %v2406_v7  ;;  %2776 = vmatprep.subr.mxu1 %v2454_v27  ;;  %v1917_v7 = vadd.f32 %v1916_v46, %v1845_v45  ;;  %v2372_v11 = vrot.slane %v2367_v5, %v3439_v51  ;;  %v2376_v15 = vrot.slane %v2367_v5, %v3442_v52 }
 0x353   : > { %2743 = vmatprep.subr.mxu0 %v2421_v10  ;;  %2777 = vmatpush3.msra.mxu1 %v2438_v29  ;;  %v2380_v27 = vrot.slane %v2367_v5, %v3445_v53  ;;  %v2722_v53 = vld [vmem:[%s3750_s11] ss:$0 sm:$0xff] }
 0x354   : > { %2744 = vmatpush3.msra.mxu0 %v2405_v12  ;;  %2778 = vmatprep.subr.mxu1 %v2453_v0 }
 0x355   : > { %2745 = vmatprep.subr.mxu0 %v2420_v14  ;;  %2779 = vmatpush3.msra.mxu1 %v2437_v33 }
 0x356   : > { %2746 = vmatpush3.msra.mxu0 %v2404_v16  ;;  %2780 = vmatprep.subr.mxu1 %v2452_v58 }
 0x357   : > { %2747 = vmatprep.subr.mxu0 %v2419_v19  ;;  %2781 = vmatpush3.msra.mxu1 %v2436_v35 }
 0x358   : > { %2748 = vmatpush3.msra.mxu0 %v2403_v22  ;;  %2782 = vmatprep.subr.mxu1 %v2451_v37 }
 0x359   : > { %2749 = vmatprep.subr.mxu0 %v2418_v24  ;;  %2783 = vmatpush3.msra.mxu1 %v2435_v39 }
 0x35a   : > { %2750 = vmatpush3.msra.mxu0 %v2402_v26  ;;  %2784 = vmatprep.subr.mxu1 %v2450_v57 }
 0x35b   : > { %2751 = vmatprep.subr.mxu0 %v2417_v28  ;;  %2785 = vmatpush3.msra.mxu1 %v2434_v34 }
 0x35c   : > { %2752 = vmatpush3.msra.mxu0 %v2401_v30  ;;  %2786 = vmatprep.subr.mxu1 %v2449_v20  ;;  %v2384_v30 = vrot.slane %v2367_v5, %v3448_v56 }
 0x35d   : > { %2753 = vmatprep.subr.mxu0 %v2416_v32  ;;  %2787 = vmatpush3.msra.mxu1 %v2433_v8 }
 0x35e   : > { %2754 = vmatpush3.msra.mxu0 %v2400_v3  ;;  %2788 = vmatprep.subr.mxu1 %v2448_v31 }
 0x35f   : > { %2755 = vmatprep.subr.mxu0 %v2415_v17  ;;  %2789 = vmatpush3.msra.mxu1 %v2432_v59 }
 0x360   : > { %2756 = vmatpush3.msra.mxu0 %v2399_v36  ;;  %2790 = vmatprep.subr.mxu1 %v2447_v60 }
 0x361   : > { %2757 = vmatprep.subr.mxu0 %v2414_v38  ;;  %2791 = vmatpush3.msra.mxu1 %v2431_v61 }
 0x362   : > { %2758 = vmatpush3.msra.mxu0 %v2398_v40  ;;  %2792 = vmatprep.subr.mxu1 %v2446_v62 }
 0x363   : > { %2759 = vmatprep.subr.mxu0 %v2413_v41  ;;  %2793 = vmatpush3.msra.mxu1 %v2430_v63 }
 0x364   : > { %2760 = vmatpush3.msra.mxu0 %v2397_v42  ;;  %2794 = vmatprep.subr.mxu1 %v2445_v1 }
 0x365   : > { %2795 = vmatpush3.msra.mxu1 %v2429_v2 }
 0x380   : > { %v1985_v47 = vpop.f32.mrf.mxu0 }
 0x381   : > { %v2056_v48 = vpop.f32.mrf.mxu1 }
 0x382   : > { %v2057_v49 = vadd.f32 %v2056_v48, %v1985_v47  ;;  %v1987_v50 = vpop.f32.mrf.mxu0 }
 0x383   : > { %v2058_v54 = vpop.f32.mrf.mxu1 }
 0x384   : > { %v2059_v55 = vadd.f32 %v2058_v54, %v1987_v50 }
 0x3c2   : > { %v2149_v6 = vpop.f32.mrf.mxu0 }
 0x3c3   : > { %v2150_v9 = vadd.f32 %v2149_v6, %v1915_v4 }
 0x3c4   : > { %v2220_v10 = vpop.f32.mrf.mxu1  ;;  %v2151_v12 = vpop.f32.mrf.mxu0 }
 0x3c5   : > { %v2221_v13 = vadd.f32 %v2220_v10, %v2150_v9  ;;  %v2152_v14 = vadd.f32 %v2151_v12, %v1917_v7 }
 0x3c6   : > { %v2222_v16 = vpop.f32.mrf.mxu1 }
 0x3c7   : > { %v2223_v18 = vadd.f32 %v2222_v16, %v2152_v14  ;;  %v2389_v19 = vadd.f32 %v2372_v11, %v2221_v13 }
 0x3c9   : > { %v2390_v21 = vadd.f32 %v2376_v15, %v2223_v18  ;;  %v2393_v23 = vmax.f32 %v2389_v19, 0.0 }
 0x3cb   : > { %v2394_v22 = vmax.f32 %v2390_v21, 0.0 }
 0x3cd   : > { %2532 = vmatprep.mubr.f32.mxu0 %v2394_v22 }
 0x3ce   : > { %2533 = vmatmul.mubr.f32.vlgmr.msra.gmra.mxu0 %v2393_v23 }
 0x404   : > { %v2291_v24 = vpop.f32.mrf.mxu0 }
 0x405   : > { %v2362_v25 = vpop.f32.mrf.mxu1  ;;  %v2292_v26 = vadd.f32 %v2291_v24, %v2057_v49 }
 0x406   : > { %v2293_v28 = vpop.f32.mrf.mxu0 }
 0x407   : > { %v2363_v51 = vadd.f32 %v2362_v25, %v2292_v26  ;;  %v2294_v29 = vadd.f32 %v2293_v28, %v2059_v55  ;;  %v2364_v0 = vpop.f32.mrf.mxu1 }
 0x409   : > { %v2365_v52 = vadd.f32 %v2364_v0, %v2294_v29  ;;  %v2391_v32 = vadd.f32 %v2380_v27, %v2363_v51 }
 0x40b   : > { %v2392_v33 = vadd.f32 %v2384_v30, %v2365_v52  ;;  %v2395_v58 = vmax.f32 %v2391_v32, 0.0 }
 0x40d   : > { %v2396_v3 = vmax.f32 %v2392_v33, 0.0 }
 0x40f   : > { %2602 = vmatprep.mubr.f32.mxu1 %v2396_v3 }
 0x410   : > { %2603 = vmatmul.mubr.f32.vlgmr.msra.gmra.mxu1 %v2395_v58 }
 0x48e   : > { %v2761_v17 = vpop.f32.mrf.mxu0 }
 0x490   : > { %v2762_v35 = vpop.f32.mrf.mxu0 }
 0x491   : > { %v2763_v36 = vadd.f32 %v2762_v35, %v2761_v17 }
 0x493   : > { %v2535_v39 = vadd.f32 %v2763_v36, %v2722_v53 }
 0x4d0   : > { %v2796_v37 = vpop.f32.mrf.mxu1 }
 0x4d2   : > { %v2797_v38 = vpop.f32.mrf.mxu1 }
 0x4d3   : > { %v2798_v40 = vadd.f32 %v2797_v38, %v2796_v37 }
 0x4d5   : > { %v2605_v56 = vadd.f32 %v2798_v40, %v2535_v39 }
 0x4d7   : > { %2609 = vst.msk [vmem:[#allocation10] sm:$0x3] %vm2608_vm2, %v2605_v56 }
 0x4d8 PF: > { %p2957_p9 = scmp.eq.s32.totalorder %s3241_s25, 2  ;;  %s3156_s30 = smov [#allocation10]  }
 0x4d9   : > { %s2617_s8 = sshll.u32 %s3156_s30, 4  ;;  %s2618_s8 = int_to_ptr.vmem [resolvable:$true] %s2617_s8 }
 0x4da   : > { %s3080_s19 = scalar_lea.vmem %s2618_s8, 32  ;;  %p3087_p11 = scmp.lt.s32.totalorder %s2618_s8, %s2618_s8 }
 0x4db   : > { %p3081_p3 = scmp.ne.s32.totalorder %s2618_s8, %s3080_s19  ;;  %p3088_p12 = scmp.lt.s32.totalorder %s3080_s19, %s3080_s19 }
 0x4dd   : > { %p3082_p7 = pnand %p3081_p3, %p2957_p9  ;;  %p3089_p0 = por %p3088_p12, %p3087_p11 }
 0x4df   : > { %p3083_p10 = pneg %p3082_p7 }
 0x4e1   : > { %p3090_p4 = pnand %p3089_p0, %p3083_p10 }
 0x4e3   : > { %3093 = shalt.err (!%p3090_p4)
}
 0x4e4   : > { %2938 = dma.vmem_to_hbm [thread:$0]  (%p2957_p9), %s2618_s8, 32, %s3751_s12, [#allocation6]  }
 0x4e5   : > { %3129 = dma.done.wait (%p2957_p9), [#allocation6], 32  }
 0x4e6   : > { %3131 = vsyncadd (%p2957_p9), [#allocation6], 4294967264 }
 0x4e7 PF: > { %p24_p1 = scmp.ge.s32.totalorder %s3291_s29, 5   ;;  %s3772_s21 = smov %s3138_s22 }
 0x4e8   : > { %s3773_s22 = smov %s3142_s23  ;;  %s3774_s23 = smov %s3302_s18 }
 0x4e9   : > { %s3775_s24 = smov %s3291_s29  ;;  %26 = sbr.rel (!%p24_p1) target bundleno = 8 (0x8), region = 124 }
 0x4ee   :  { %2630 = vsyncpa [#allocation5], 1 }
 0x4ef   :  { %2632 = vsyncpa [#allocation5 + $0x1], 1 }
 0x4f0   :  { %2633 = vsyncpa [#allocation8], 1 }
 0x4f1   :  { %2634 = vsyncpa [#allocation6], 1 }
 0x4f2   :  { %2636 = vsyncpa [#allocation6 + $0x1], 1 }

</bundles_post_ra>
